<compile_context>
chip_gen: v6e
topology: v6e:2x2x1
jax: 0.10.0
libtpu: 0.0.40
codegen_flags: <defaults>
</compile_context>

<pallas_src>
import numpy as np

import jax
import jax.numpy as jnp
from jax import lax
from jax.experimental import pallas as pl
from jax.experimental.pallas import tpu as pltpu


# ---------------------------------------------------------------------------
# Fused Pallas kernel
# ---------------------------------------------------------------------------
def _cnn_fused_kernel(x_ref, w1_ref, b1_ref, w2_ref, b2_ref,
                      v1_ref, bf1_ref, v2_ref, bf2_ref, v3_ref, bf3_ref,
                      o_ref):
    f32 = jnp.float32
    bf16 = jnp.bfloat16
    TB = o_ref.shape[0]                       # batch-tile size (multiple of 16)

    # ---- conv1 (1->6, 5x5) + bias + ReLU + 2x2 max-pool --------------------
    # x_ref: (24, TB, 140) bf16, rows = (oh, b), lanes = di*28 + iw (taps in K).
    xv = x_ref[...].reshape(24 * TB, 140)
    z1 = jnp.dot(xv, w1_ref[...], preferred_element_type=f32)     # (24*TB, 256)
    z1 = jnp.maximum(z1 + b1_ref[...], 0.0)
    zp = jnp.maximum(z1[:, :128], z1[:, 128:])        # pool over W (pw lanes)
    zp = zp.reshape(12, 2, TB, 128)                   # rows = (hp, parity, b)
    h1 = jnp.maximum(zp[:, 0], zp[:, 1]).astype(bf16)  # pool over H -> (12, TB, 128)

    # ---- conv2 (6->16, 3x3) + bias + ReLU + 2x2 max-pool --------------------
    # Fold the 3 row taps into K=384 via a lane-concat of contiguous row blocks.
    cat2 = jnp.concatenate([h1[di:di + 10] for di in range(3)], axis=2)
    cat2 = cat2.reshape(10 * TB, 384)                  # rows = (oh2, b)
    z2 = jnp.dot(cat2, w2_ref[...], preferred_element_type=f32)   # (10*TB, 256)
    z2 = jnp.maximum(z2 + b2_ref[...], 0.0)
    zq = jnp.maximum(z2[:, :128], z2[:, 128:])        # pool over W
    zq = zq.reshape(5, 2, TB, 128)
    p = jnp.maximum(zq[:, 0], zq[:, 1]).astype(bf16)   # pool over H -> (5, TB, 128)

    # ---- fc1 + ReLU: fold the 5 hq planes into K=640 ------------------------
    catf = jnp.concatenate([p[hq] for hq in range(5)], axis=1)     # (TB, 640)
    a = jnp.maximum(jnp.dot(catf, v1_ref[...], preferred_element_type=f32)
                    + bf1_ref[...], 0.0)

    # ---- fc2 + ReLU, fc3 (lane-dense 128x128 matmuls) -----------------------
    a = jnp.maximum(jnp.dot(a.astype(bf16), v2_ref[...],
                            preferred_element_type=f32) + bf2_ref[...], 0.0)
    o_ref[...] = (jnp.dot(a.astype(bf16), v3_ref[...],
                          preferred_element_type=f32) + bf3_ref[...])


# ---------------------------------------------------------------------------
# One-time parameter repacking (outside the hot path)
# ---------------------------------------------------------------------------
def prepare_params(params):
    w1 = np.asarray(params["conv1"][0], np.float32)      # (6,1,5,5)
    b1 = np.asarray(params["conv1"][1], np.float32)      # (6,)
    w2 = np.asarray(params["conv2"][0], np.float32)      # (16,6,3,3)
    b2 = np.asarray(params["conv2"][1], np.float32)      # (16,)
    (f1w, f1b), (f2w, f2b), (f3w, f3b) = [
        (np.asarray(w, np.float32), np.asarray(b, np.float32))
        for (w, b) in params["fc"]]

    # conv1 banded weight with taps folded into K:
    #   w1cat[di*28 + iw, pw*128 + wp*6 + o] = w1[o, 0, di, iw - (2*wp + pw)]
    w1cat = np.zeros((140, 256), np.float32)
    b1row = np.zeros((1, 256), np.float32)
    for pw in range(2):
        for wp in range(12):
            col = pw * 128 + wp * 6
            b1row[0, col:col + 6] = b1
            for di in range(5):
                for dj in range(5):
                    iw = 2 * wp + pw + dj
                    w1cat[di * 28 + iw, col:col + 6] = w1[:, 0, di, dj]

    # conv2 banded weight with taps folded into K:
    #   w2cat[di*128 + wp*6 + c, pw*128 + wq*16 + o2] = w2[o2, c, di, wp-(2*wq+pw)]
    w2cat = np.zeros((384, 256), np.float32)
    b2row = np.zeros((1, 256), np.float32)
    for pw in range(2):
        for wq in range(5):
            col = pw * 128 + wq * 16
            b2row[0, col:col + 16] = b2
            for di in range(3):
                for dj in range(3):
                    wp = 2 * wq + pw + dj
                    row = di * 128 + wp * 6
                    w2cat[row:row + 6, col:col + 16] = w2[:, :, di, dj].T

    # fc1 with the 5 hq planes folded into K:
    #   v1cat[hq*128 + wq*16 + o2, n] = f1w[n, o2*25 + hq*5 + wq]
    v1 = f1w.reshape(120, 16, 5, 5).transpose(2, 3, 1, 0)   # [hq, wq, o2, n]
    v1cat = np.zeros((640, 128), np.float32)
    for hq in range(5):
        v1cat[hq * 128:hq * 128 + 80, :120] = v1[hq].reshape(80, 120)
    bf1 = np.zeros((1, 128), np.float32); bf1[0, :120] = f1b

    # fc2 / fc3: zero-padded to lane-dense 128x128.
    v2 = np.zeros((128, 128), np.float32); v2[:120, :84] = f2w.T
    bf2 = np.zeros((1, 128), np.float32); bf2[0, :84] = f2b
    v3 = np.zeros((128, 128), np.float32); v3[:84, :10] = f3w.T
    bf3 = np.zeros((1, 128), np.float32); bf3[0, :10] = f3b

    bf = jnp.bfloat16
    return (jnp.asarray(w1cat, bf), jnp.asarray(b1row),
            jnp.asarray(w2cat, bf), jnp.asarray(b2row),
            jnp.asarray(v1cat, bf), jnp.asarray(bf1),
            jnp.asarray(v2, bf), jnp.asarray(bf2),
            jnp.asarray(v3, bf), jnp.asarray(bf3))


# ---------------------------------------------------------------------------
# Forward pass
# ---------------------------------------------------------------------------
def _padded_batch_and_tile(B):
    # bf16 activations -> keep the tile a multiple of 16 sublanes; cap at 64
    # and target >= 4 grid blocks (megacore sharding on v7x + pipelining).
    if B <= 64:
        Bp = ((B + 15) // 16) * 16
        return Bp, 16
    Bp = ((B + 63) // 64) * 64
    TB = 64 if Bp // 64 >= 4 else 32
    return Bp, TB


def _whole(shape):
    return pl.BlockSpec(shape, lambda *_: (0,) * len(shape))


@jax.jit
def cnn_forward(x, prepped):
    # x: (B, 1, 28, 28) NCHW — MNIST geometry is required (fc1 expects 16*5*5).
    assert x.shape[1:] == (1, 28, 28), x.shape
    B = x.shape[0]
    Bp, TB = _padded_batch_and_tile(B)

    xs = x.reshape(B, 28, 28).astype(jnp.bfloat16)
    if Bp != B:                                 # pad batch to a tile multiple
        xs = jnp.concatenate(
            [xs, jnp.zeros((Bp - B, 28, 28), jnp.bfloat16)], axis=0)
    # Shifted row-concat (taps folded into K): x_cat[b, oh, di*28+w] = x[b, oh+di, w]
    x_cat = jnp.concatenate([xs[:, di:di + 24, :] for di in range(5)], axis=2)
    x_hm = jnp.transpose(x_cat, (1, 0, 2))      # (24, Bp, 140), height-major

    w1cat, b1row, w2cat, b2row, v1cat, bf1, v2, bf2, v3, bf3 = prepped

    out = pl.pallas_call(
        _cnn_fused_kernel,
        out_shape=jax.ShapeDtypeStruct((Bp, 128), jnp.float32),
        grid=(Bp // TB,),
        in_specs=[
            pl.BlockSpec((24, TB, 140), lambda i: (0, i, 0)),
            _whole(w1cat.shape), _whole(b1row.shape),
            _whole(w2cat.shape), _whole(b2row.shape),
            _whole(v1cat.shape), _whole(bf1.shape),
            _whole(v2.shape), _whole(bf2.shape),
            _whole(v3.shape), _whole(bf3.shape),
        ],
        out_specs=pl.BlockSpec((TB, 128), lambda i: (i, 0)),
        compiler_params=pltpu.CompilerParams(
            dimension_semantics=("parallel",),
            vmem_limit_bytes=48 * 1024 * 1024,
        ),
    )(x_hm, w1cat, b1row, w2cat, b2row, v1cat, bf1, v2, bf2, v3, bf3)

    return out[:B, :10]


# ---------------------------------------------------------------------------
# Parameters (deterministic, PyTorch-shaped) + pure-JAX reference
# ---------------------------------------------------------------------------
def init_params(key):
    ks = jax.random.split(key, 10)

    def u(k, shape, fan_in):
        bound = 1.0 / jnp.sqrt(jnp.float32(fan_in))
        return jax.random.uniform(k, shape, jnp.float32, -bound, bound)

    return dict(
        conv1=(u(ks[0], (6, 1, 5, 5), 25), u(ks[1], (6,), 25)),
        conv2=(u(ks[2], (16, 6, 3, 3), 54), u(ks[3], (16,), 54)),
        fc=((u(ks[4], (120, 400), 400), u(ks[5], (120,), 400)),
            (u(ks[6], (84, 120), 120), u(ks[7], (84,), 120)),
            (u(ks[8], (10, 84), 84), u(ks[9], (10,), 84))),
    )


def _reference_forward(x, params):
    w1, b1 = params["conv1"]
    w2, b2 = params["conv2"]
    (f1w, f1b), (f2w, f2b), (f3w, f3b) = params["fc"]
    dn = ("NCHW", "OIHW", "NCHW")
    y = lax.conv_general_dilated(x, w1, (1, 1), "VALID", dimension_numbers=dn)
    y = jnp.maximum(y + b1[None, :, None, None], 0.0)
    y = lax.reduce_window(y, -jnp.inf, lax.max, (1, 1, 2, 2), (1, 1, 2, 2), "VALID")
    y = lax.conv_general_dilated(y, w2, (1, 1), "VALID", dimension_numbers=dn)
    y = jnp.maximum(y + b2[None, :, None, None], 0.0)
    y = lax.reduce_window(y, -jnp.inf, lax.max, (1, 1, 2, 2), (1, 1, 2, 2), "VALID")
    y = y.reshape(y.shape[0], -1)
    y = jnp.maximum(y @ f1w.T + f1b, 0.0)
    y = jnp.maximum(y @ f2w.T + f2b, 0.0)
    return y @ f3w.T + f3b


if __name__ == "__main__":
    key = jax.random.PRNGKey(0)
    pkey, xkey = jax.random.split(key)
    params = init_params(pkey)
    prepped = prepare_params(params)            # one-time weight repacking

    x = jax.random.normal(xkey, (2, 1, 28, 28), jnp.float32)
    out = cnn_forward(x, prepped)
    jax.block_until_ready(out)
    assert out.shape == (2, 10) and out.dtype == jnp.float32

    ref = _reference_forward(x, params)
    err = float(jnp.max(jnp.abs(out - ref)))
    # bf16 MXU inputs (f32 accumulation): tolerance loosened per the review.
    assert err < 5e-2, f"max abs err vs f32 reference: {err}"

    print("KERNEL_OK")
</pallas_src>

<mosaic_0001>
module attributes {stable_mosaic.version = 11 : i64} {
  func.func @_cnn_fused_kernel(%arg0: i32, %arg1: memref<24x16x140xbf16, #tpu.memory_space<vmem>>, %arg2: memref<140x256xbf16, #tpu.memory_space<vmem>>, %arg3: memref<1x256xf32, #tpu.memory_space<vmem>>, %arg4: memref<384x256xbf16, #tpu.memory_space<vmem>>, %arg5: memref<1x256xf32, #tpu.memory_space<vmem>>, %arg6: memref<640x128xbf16, #tpu.memory_space<vmem>>, %arg7: memref<1x128xf32, #tpu.memory_space<vmem>>, %arg8: memref<128x128xbf16, #tpu.memory_space<vmem>>, %arg9: memref<1x128xf32, #tpu.memory_space<vmem>>, %arg10: memref<128x128xbf16, #tpu.memory_space<vmem>>, %arg11: memref<1x128xf32, #tpu.memory_space<vmem>>, %arg12: memref<16x128xf32, #tpu.memory_space<vmem>>) attributes {dimension_semantics = [#tpu.dimension_semantics<parallel>], iteration_bounds = array<i64: 1>, scalar_prefetch = 0 : i64, scratch_operands = 0 : i64, tpu.core_type = #tpu.core_type<tc>, window_params = [{transform_indices = @transform_0, window_bounds = array<i64: 24, 16, 140>}, {pipeline_mode = #tpu.pipeline_mode<synchronous>, transform_indices = @transform_1, window_bounds = array<i64: 140, 256>}, {pipeline_mode = #tpu.pipeline_mode<synchronous>, transform_indices = @transform_2, window_bounds = array<i64: 1, 256>}, {pipeline_mode = #tpu.pipeline_mode<synchronous>, transform_indices = @transform_3, window_bounds = array<i64: 384, 256>}, {pipeline_mode = #tpu.pipeline_mode<synchronous>, transform_indices = @transform_4, window_bounds = array<i64: 1, 256>}, {pipeline_mode = #tpu.pipeline_mode<synchronous>, transform_indices = @transform_5, window_bounds = array<i64: 640, 128>}, {pipeline_mode = #tpu.pipeline_mode<synchronous>, transform_indices = @transform_6, window_bounds = array<i64: 1, 128>}, {pipeline_mode = #tpu.pipeline_mode<synchronous>, transform_indices = @transform_7, window_bounds = array<i64: 128, 128>}, {pipeline_mode = #tpu.pipeline_mode<synchronous>, transform_indices = @transform_8, window_bounds = array<i64: 1, 128>}, {pipeline_mode = #tpu.pipeline_mode<synchronous>, transform_indices = @transform_9, window_bounds = array<i64: 128, 128>}, {pipeline_mode = #tpu.pipeline_mode<synchronous>, transform_indices = @transform_10, window_bounds = array<i64: 1, 128>}, {transform_indices = @transform_11, window_bounds = array<i64: 16, 128>}]} {
    %c0 = arith.constant 0 : index
    %c0_0 = arith.constant 0 : index
    %c0_1 = arith.constant 0 : index
    %0 = vector.load %arg1[%c0, %c0_0, %c0_1] : memref<24x16x140xbf16, #tpu.memory_space<vmem>>, vector<24x16x140xbf16>
    %1 = vector.shape_cast %0 : vector<24x16x140xbf16> to vector<384x140xbf16>
    %c0_2 = arith.constant 0 : index
    %c0_3 = arith.constant 0 : index
    %2 = vector.load %arg2[%c0_2, %c0_3] : memref<140x256xbf16, #tpu.memory_space<vmem>>, vector<140x256xbf16>
    %cst = arith.constant dense<0.000000e+00> : vector<384x256xf32>
    %3 = tpu.matmul %1, %2, %cst {dimension_numbers = #tpu.dot_dimension_numbers<[1], [0], [0], [1], [0, 0, 1, 1], [], []>} : vector<384x140xbf16>, vector<140x256xbf16>, vector<384x256xf32> -> vector<384x256xf32>
    %c0_4 = arith.constant 0 : index
    %c0_5 = arith.constant 0 : index
    %4 = vector.load %arg3[%c0_4, %c0_5] : memref<1x256xf32, #tpu.memory_space<vmem>>, vector<1x256xf32>
    %5 = vector.broadcast %4 : vector<1x256xf32> to vector<384x256xf32>
    %6 = arith.addf %3, %5 : vector<384x256xf32>
    %cst_6 = arith.constant 0.000000e+00 : f32
    %7 = vector.broadcast %cst_6 : f32 to vector<384x256xf32>
    %8 = arith.maximumf %6, %7 : vector<384x256xf32>
    %9 = vector.extract_strided_slice %8 {offsets = [0, 0], sizes = [384, 128], strides = [1, 1]} : vector<384x256xf32> to vector<384x128xf32>
    %10 = vector.extract_strided_slice %8 {offsets = [0, 128], sizes = [384, 128], strides = [1, 1]} : vector<384x256xf32> to vector<384x128xf32>
    %11 = arith.maximumf %9, %10 : vector<384x128xf32>
    %12 = vector.shape_cast %11 : vector<384x128xf32> to vector<12x2x16x128xf32>
    %13 = vector.extract_strided_slice %12 {offsets = [0, 0, 0, 0], sizes = [12, 1, 16, 128], strides = [1, 1, 1, 1]} : vector<12x2x16x128xf32> to vector<12x1x16x128xf32>
    %14 = vector.shape_cast %13 : vector<12x1x16x128xf32> to vector<12x16x128xf32>
    %15 = vector.extract_strided_slice %12 {offsets = [0, 1, 0, 0], sizes = [12, 1, 16, 128], strides = [1, 1, 1, 1]} : vector<12x2x16x128xf32> to vector<12x1x16x128xf32>
    %16 = vector.shape_cast %15 : vector<12x1x16x128xf32> to vector<12x16x128xf32>
    %17 = arith.maximumf %14, %16 : vector<12x16x128xf32>
    %18 = arith.truncf %17 : vector<12x16x128xf32> to vector<12x16x128xbf16>
    %19 = vector.extract_strided_slice %18 {offsets = [0, 0, 0], sizes = [10, 16, 128], strides = [1, 1, 1]} : vector<12x16x128xbf16> to vector<10x16x128xbf16>
    %20 = vector.extract_strided_slice %18 {offsets = [1, 0, 0], sizes = [10, 16, 128], strides = [1, 1, 1]} : vector<12x16x128xbf16> to vector<10x16x128xbf16>
    %21 = vector.extract_strided_slice %18 {offsets = [2, 0, 0], sizes = [10, 16, 128], strides = [1, 1, 1]} : vector<12x16x128xbf16> to vector<10x16x128xbf16>
    %22 = tpu.concatenate %19, %20, %21 in 2 : vector<10x16x128xbf16>, vector<10x16x128xbf16>, vector<10x16x128xbf16> -> vector<10x16x384xbf16>
    %23 = vector.shape_cast %22 : vector<10x16x384xbf16> to vector<160x384xbf16>
    %c0_7 = arith.constant 0 : index
    %c0_8 = arith.constant 0 : index
    %24 = vector.load %arg4[%c0_7, %c0_8] : memref<384x256xbf16, #tpu.memory_space<vmem>>, vector<384x256xbf16>
    %cst_9 = arith.constant dense<0.000000e+00> : vector<160x256xf32>
    %25 = tpu.matmul %23, %24, %cst_9 {dimension_numbers = #tpu.dot_dimension_numbers<[1], [0], [0], [1], [0, 0, 1, 1], [], []>} : vector<160x384xbf16>, vector<384x256xbf16>, vector<160x256xf32> -> vector<160x256xf32>
    %c0_10 = arith.constant 0 : index
    %c0_11 = arith.constant 0 : index
    %26 = vector.load %arg5[%c0_10, %c0_11] : memref<1x256xf32, #tpu.memory_space<vmem>>, vector<1x256xf32>
    %27 = vector.broadcast %26 : vector<1x256xf32> to vector<160x256xf32>
    %28 = arith.addf %25, %27 : vector<160x256xf32>
    %cst_12 = arith.constant 0.000000e+00 : f32
    %29 = vector.broadcast %cst_12 : f32 to vector<160x256xf32>
    %30 = arith.maximumf %28, %29 : vector<160x256xf32>
    %31 = vector.extract_strided_slice %30 {offsets = [0, 0], sizes = [160, 128], strides = [1, 1]} : vector<160x256xf32> to vector<160x128xf32>
    %32 = vector.extract_strided_slice %30 {offsets = [0, 128], sizes = [160, 128], strides = [1, 1]} : vector<160x256xf32> to vector<160x128xf32>
    %33 = arith.maximumf %31, %32 : vector<160x128xf32>
    %34 = vector.shape_cast %33 : vector<160x128xf32> to vector<5x2x16x128xf32>
    %35 = vector.extract_strided_slice %34 {offsets = [0, 0, 0, 0], sizes = [5, 1, 16, 128], strides = [1, 1, 1, 1]} : vector<5x2x16x128xf32> to vector<5x1x16x128xf32>
    %36 = vector.shape_cast %35 : vector<5x1x16x128xf32> to vector<5x16x128xf32>
    %37 = vector.extract_strided_slice %34 {offsets = [0, 1, 0, 0], sizes = [5, 1, 16, 128], strides = [1, 1, 1, 1]} : vector<5x2x16x128xf32> to vector<5x1x16x128xf32>
    %38 = vector.shape_cast %37 : vector<5x1x16x128xf32> to vector<5x16x128xf32>
    %39 = arith.maximumf %36, %38 : vector<5x16x128xf32>
    %40 = arith.truncf %39 : vector<5x16x128xf32> to vector<5x16x128xbf16>
    %41 = vector.extract_strided_slice %40 {offsets = [0, 0, 0], sizes = [1, 16, 128], strides = [1, 1, 1]} : vector<5x16x128xbf16> to vector<1x16x128xbf16>
    %42 = vector.shape_cast %41 : vector<1x16x128xbf16> to vector<16x128xbf16>
    %43 = vector.extract_strided_slice %40 {offsets = [1, 0, 0], sizes = [1, 16, 128], strides = [1, 1, 1]} : vector<5x16x128xbf16> to vector<1x16x128xbf16>
    %44 = vector.shape_cast %43 : vector<1x16x128xbf16> to vector<16x128xbf16>
    %45 = vector.extract_strided_slice %40 {offsets = [2, 0, 0], sizes = [1, 16, 128], strides = [1, 1, 1]} : vector<5x16x128xbf16> to vector<1x16x128xbf16>
    %46 = vector.shape_cast %45 : vector<1x16x128xbf16> to vector<16x128xbf16>
    %47 = vector.extract_strided_slice %40 {offsets = [3, 0, 0], sizes = [1, 16, 128], strides = [1, 1, 1]} : vector<5x16x128xbf16> to vector<1x16x128xbf16>
    %48 = vector.shape_cast %47 : vector<1x16x128xbf16> to vector<16x128xbf16>
    %49 = vector.extract_strided_slice %40 {offsets = [4, 0, 0], sizes = [1, 16, 128], strides = [1, 1, 1]} : vector<5x16x128xbf16> to vector<1x16x128xbf16>
    %50 = vector.shape_cast %49 : vector<1x16x128xbf16> to vector<16x128xbf16>
    %51 = tpu.concatenate %42, %44, %46, %48, %50 in 1 : vector<16x128xbf16>, vector<16x128xbf16>, vector<16x128xbf16>, vector<16x128xbf16>, vector<16x128xbf16> -> vector<16x640xbf16>
    %c0_13 = arith.constant 0 : index
    %c0_14 = arith.constant 0 : index
    %52 = vector.load %arg6[%c0_13, %c0_14] : memref<640x128xbf16, #tpu.memory_space<vmem>>, vector<640x128xbf16>
    %cst_15 = arith.constant dense<0.000000e+00> : vector<16x128xf32>
    %53 = tpu.matmul %51, %52, %cst_15 {dimension_numbers = #tpu.dot_dimension_numbers<[1], [0], [0], [1], [0, 0, 1, 1], [], []>} : vector<16x640xbf16>, vector<640x128xbf16>, vector<16x128xf32> -> vector<16x128xf32>
    %c0_16 = arith.constant 0 : index
    %c0_17 = arith.constant 0 : index
    %54 = vector.load %arg7[%c0_16, %c0_17] : memref<1x128xf32, #tpu.memory_space<vmem>>, vector<1x128xf32>
    %55 = vector.broadcast %54 : vector<1x128xf32> to vector<16x128xf32>
    %56 = arith.addf %53, %55 : vector<16x128xf32>
    %cst_18 = arith.constant 0.000000e+00 : f32
    %57 = vector.broadcast %cst_18 : f32 to vector<16x128xf32>
    %58 = arith.maximumf %56, %57 : vector<16x128xf32>
    %59 = arith.truncf %58 : vector<16x128xf32> to vector<16x128xbf16>
    %c0_19 = arith.constant 0 : index
    %c0_20 = arith.constant 0 : index
    %60 = vector.load %arg8[%c0_19, %c0_20] : memref<128x128xbf16, #tpu.memory_space<vmem>>, vector<128x128xbf16>
    %cst_21 = arith.constant dense<0.000000e+00> : vector<16x128xf32>
    %61 = tpu.matmul %59, %60, %cst_21 {dimension_numbers = #tpu.dot_dimension_numbers<[1], [0], [0], [1], [0, 0, 1, 1], [], []>} : vector<16x128xbf16>, vector<128x128xbf16>, vector<16x128xf32> -> vector<16x128xf32>
    %c0_22 = arith.constant 0 : index
    %c0_23 = arith.constant 0 : index
    %62 = vector.load %arg9[%c0_22, %c0_23] : memref<1x128xf32, #tpu.memory_space<vmem>>, vector<1x128xf32>
    %63 = vector.broadcast %62 : vector<1x128xf32> to vector<16x128xf32>
    %64 = arith.addf %61, %63 : vector<16x128xf32>
    %cst_24 = arith.constant 0.000000e+00 : f32
    %65 = vector.broadcast %cst_24 : f32 to vector<16x128xf32>
    %66 = arith.maximumf %64, %65 : vector<16x128xf32>
    %67 = arith.truncf %66 : vector<16x128xf32> to vector<16x128xbf16>
    %c0_25 = arith.constant 0 : index
    %c0_26 = arith.constant 0 : index
    %68 = vector.load %arg10[%c0_25, %c0_26] : memref<128x128xbf16, #tpu.memory_space<vmem>>, vector<128x128xbf16>
    %cst_27 = arith.constant dense<0.000000e+00> : vector<16x128xf32>
    %69 = tpu.matmul %67, %68, %cst_27 {dimension_numbers = #tpu.dot_dimension_numbers<[1], [0], [0], [1], [0, 0, 1, 1], [], []>} : vector<16x128xbf16>, vector<128x128xbf16>, vector<16x128xf32> -> vector<16x128xf32>
    %c0_28 = arith.constant 0 : index
    %c0_29 = arith.constant 0 : index
    %70 = vector.load %arg11[%c0_28, %c0_29] : memref<1x128xf32, #tpu.memory_space<vmem>>, vector<1x128xf32>
    %71 = vector.broadcast %70 : vector<1x128xf32> to vector<16x128xf32>
    %72 = arith.addf %69, %71 : vector<16x128xf32>
    %c0_30 = arith.constant 0 : index
    %c0_31 = arith.constant 0 : index
    %73 = vector.load %arg12[%c0_30, %c0_31] : memref<16x128xf32, #tpu.memory_space<vmem>>, vector<16x128xf32>
    tpu.vector_store %arg12[%c0_30, %c0_31], %72 {strides = array<i32>} : memref<16x128xf32, #tpu.memory_space<vmem>>, vector<16x128xf32>,
    return
  }
  func.func @transform_0(%arg0: i32) -> (i32, i32, i32) {
    %c0_i32 = arith.constant 0 : i32
    %c0_i32_0 = arith.constant 0 : i32
    %c0_i32_1 = arith.constant 0 : i32
    return %c0_i32, %arg0, %c0_i32_0 : i32, i32, i32
  }
  func.func @transform_1(%arg0: i32) -> (i32, i32) {
    %c0_i32 = arith.constant 0 : i32
    %c0_i32_0 = arith.constant 0 : i32
    %c0_i32_1 = arith.constant 0 : i32
    return %c0_i32, %c0_i32_0 : i32, i32
  }
  func.func @transform_2(%arg0: i32) -> (i32, i32) {
    %c0_i32 = arith.constant 0 : i32
    %c0_i32_0 = arith.constant 0 : i32
    %c0_i32_1 = arith.constant 0 : i32
    return %c0_i32, %c0_i32_0 : i32, i32
  }
  func.func @transform_3(%arg0: i32) -> (i32, i32) {
    %c0_i32 = arith.constant 0 : i32
    %c0_i32_0 = arith.constant 0 : i32
    %c0_i32_1 = arith.constant 0 : i32
    return %c0_i32, %c0_i32_0 : i32, i32
  }
  func.func @transform_4(%arg0: i32) -> (i32, i32) {
    %c0_i32 = arith.constant 0 : i32
    %c0_i32_0 = arith.constant 0 : i32
    %c0_i32_1 = arith.constant 0 : i32
    return %c0_i32, %c0_i32_0 : i32, i32
  }
  func.func @transform_5(%arg0: i32) -> (i32, i32) {
    %c0_i32 = arith.constant 0 : i32
    %c0_i32_0 = arith.constant 0 : i32
    %c0_i32_1 = arith.constant 0 : i32
    return %c0_i32, %c0_i32_0 : i32, i32
  }
  func.func @transform_6(%arg0: i32) -> (i32, i32) {
    %c0_i32 = arith.constant 0 : i32
    %c0_i32_0 = arith.constant 0 : i32
    %c0_i32_1 = arith.constant 0 : i32
    return %c0_i32, %c0_i32_0 : i32, i32
  }
  func.func @transform_7(%arg0: i32) -> (i32, i32) {
    %c0_i32 = arith.constant 0 : i32
    %c0_i32_0 = arith.constant 0 : i32
    %c0_i32_1 = arith.constant 0 : i32
    return %c0_i32, %c0_i32_0 : i32, i32
  }
  func.func @transform_8(%arg0: i32) -> (i32, i32) {
    %c0_i32 = arith.constant 0 : i32
    %c0_i32_0 = arith.constant 0 : i32
    %c0_i32_1 = arith.constant 0 : i32
    return %c0_i32, %c0_i32_0 : i32, i32
  }
  func.func @transform_9(%arg0: i32) -> (i32, i32) {
    %c0_i32 = arith.constant 0 : i32
    %c0_i32_0 = arith.constant 0 : i32
    %c0_i32_1 = arith.constant 0 : i32
    return %c0_i32, %c0_i32_0 : i32, i32
  }
  func.func @transform_10(%arg0: i32) -> (i32, i32) {
    %c0_i32 = arith.constant 0 : i32
    %c0_i32_0 = arith.constant 0 : i32
    %c0_i32_1 = arith.constant 0 : i32
    return %c0_i32, %c0_i32_0 : i32, i32
  }
  func.func @transform_11(%arg0: i32) -> (i32, i32) {
    %c0_i32 = arith.constant 0 : i32
    %c0_i32_0 = arith.constant 0 : i32
    return %arg0, %c0_i32 : i32, i32
  }
}

</mosaic_0001>

<bundles_post_ra>
// kernel: cnn_forward.1
= control target key start
LH: loop header
LB: loop body
LE: loop exit
PB: predicated region body
PF: predicated region fallthrough
CT: control target
= control target key end

     0   :  { %vm421_vm0 = vcmask 97280   ;;  %vm494_vm1 = vcmask 1045504   ;;  %vm2842_vm2 = vmmov 0   ;;  %s3818_s1 = inlined_call_operand.vmem [shape: bf16[140,256], index: 1, kind: input, shape index: {}]   ;;  %s3819_s0 = inlined_call_operand.vmem [shape: bf16[24,16,140], index: 0, kind: input, shape index: {}]   ;;  %s3820_s3 = inlined_call_operand.vmem [shape: bf16[384,256], index: 3, kind: input, shape index: {}]   ;;  %s3821_s2 = inlined_call_operand.vmem [shape: f32[1,256], index: 2, kind: input, shape index: {}]   ;;  %s3822_s5 = inlined_call_operand.vmem [shape: bf16[640,128], index: 5, kind: input, shape index: {}]   ;;  %s3823_s4 = inlined_call_operand.vmem [shape: f32[1,256], index: 4, kind: input, shape index: {}]   ;;  %s3824_s7 = inlined_call_operand.vmem [shape: bf16[128,128], index: 7, kind: input, shape index: {}]   ;;  %s3825_s9 = inlined_call_operand.vmem [shape: bf16[128,128], index: 9, kind: input, shape index: {}]   ;;  %s3826_s6 = inlined_call_operand.vmem [shape: f32[1,128], index: 6, kind: input, shape index: {}]   ;;  %s3827_s8 = inlined_call_operand.vmem [shape: f32[1,128], index: 8, kind: input, shape index: {}]   ;;  %s3828_s10 = inlined_call_operand.vmem [shape: f32[1,128], index: 10, kind: input, shape index: {}]   ;;  %s3829_s11 = inlined_call_operand.vmem [shape: f32[16,128], index: 11, kind: output, shape index: {}]  }
   0x1   :  { %v2613_v0 = vld [vmem:[%s3818_s1 + $0x74] ss:$8 sps:$4 sm:$0xff]   ;;  %v2615_v1 = vld [vmem:[%s3818_s1 + $0x70] ss:$8 sps:$4 sm:$0xff]   ;;  %v2616_v2 = vld [vmem:[%s3818_s1 + $0x64] ss:$8 sps:$4 sm:$0xff]  }
   0x2   :  { %501 = vmatprep.subr.bf16.mxu0 %v2613_v0  ;;  %v2618_v3 = vld [vmem:[%s3818_s1 + $0x60] ss:$8 sps:$4 sm:$0xff]   ;;  %v2619_v4 = vld [vmem:[%s3818_s1 + $0x54] ss:$8 sps:$4 sm:$0xff]   ;;  %v2621_v5 = vld [vmem:[%s3818_s1 + $0x50] ss:$8 sps:$4 sm:$0xff]  }
   0x3   :  { %502 = vmatpush1.bf16.msra.mxu0 %v2615_v1  ;;  %v2622_v6 = vld [vmem:[%s3818_s1 + $0x44] ss:$8 sps:$4 sm:$0xff]   ;;  %v2624_v7 = vld [vmem:[%s3818_s1 + $0x40] ss:$8 sps:$4 sm:$0xff]   ;;  %v2625_v8 = vld [vmem:[%s3818_s1 + $0x34] ss:$8 sps:$4 sm:$0xff]  }
   0x4   :  { %503 = vmatprep.subr.bf16.mxu0 %v2616_v2  ;;  %v2642_v9 = vld [vmem:[%s3819_s0 + $0x4] ss:$8 sps:$4 sm:$0xff]   ;;  %v2627_v10 = vld [vmem:[%s3818_s1 + $0x30] ss:$8 sps:$4 sm:$0xff]   ;;  %v2630_v12 = vld [vmem:[%s3818_s1 + $0x20] ss:$8 sps:$4 sm:$0xff]  }
   0x5   :  { %2348 = vmatprep.mubr.msk.bf16.mxu0 %vm421_vm0, %v2642_v9  ;;  %v2628_v11 = vld [vmem:[%s3818_s1 + $0x24] ss:$8 sps:$4 sm:$0xff]   ;;  %v2631_v13 = vld [vmem:[%s3818_s1 + $0x14] ss:$8 sps:$4 sm:$0xff]   ;;  %v2633_v14 = vld [vmem:[%s3818_s1 + $0x10] ss:$8 sps:$4 sm:$0xff]  }
   0x6   :  { %v2634_v15 = vld [vmem:[%s3818_s1 + $0x4] ss:$8 sps:$4 sm:$0xff]   ;;  %v2636_v16 = vld [vmem:[%s3818_s1] ss:$8 sps:$4 sm:$0xff]   ;;  %v2643_v21 = vld [vmem:[%s3819_s0 + $0x14] ss:$8 sps:$4 sm:$0xff]  }
   0x7   :  { %504 = vmatpush1.bf16.msra.mxu0 %v2618_v3  ;;  %v2637_v17 = vld [vmem:[%s3818_s1 + $0x84] ss:$8 sps:$4 sm:$0x3f]   ;;  %v2639_v18 = vld [vmem:[%s3818_s1 + $0x80] ss:$8 sps:$4 sm:$0x3f]  }
   0x8   :  { %505 = vmatprep.subr.bf16.mxu0 %v2619_v4  ;;  %v496_v19 = vsel %vm494_vm1, %v2639_v18, 0  ;;  %v2640_v20 = vld [vmem:[%s3819_s0] ss:$8 sps:$4 sm:$0xff]   ;;  %v2645_v22 = vld [vmem:[%s3819_s0 + $0x10] ss:$8 sps:$4 sm:$0xff]  }
   0x9   :  { %v2646_v23 = vld [vmem:[%s3819_s0 + $0x24] ss:$8 sps:$4 sm:$0xff]   ;;  %v2648_v24 = vld [vmem:[%s3819_s0 + $0x20] ss:$8 sps:$4 sm:$0xff]   ;;  %v2649_v25 = vld [vmem:[%s3819_s0 + $0x34] ss:$8 sps:$4 sm:$0xff]  }
   0xa   :  { %v2651_v26 = vld [vmem:[%s3819_s0 + $0x30] ss:$8 sps:$4 sm:$0xff]   ;;  %v2652_v27 = vld [vmem:[%s3819_s0 + $0x44] ss:$8 sps:$4 sm:$0xff]   ;;  %v2654_v28 = vld [vmem:[%s3819_s0 + $0x40] ss:$8 sps:$4 sm:$0xff]  }
   0xb   :  { %506 = vmatpush1.bf16.msra.mxu0 %v2621_v5  ;;  %v2655_v29 = vld [vmem:[%s3819_s0 + $0x54] ss:$8 sps:$4 sm:$0xff]   ;;  %v2657_v30 = vld [vmem:[%s3819_s0 + $0x50] ss:$8 sps:$4 sm:$0xff]   ;;  %v2658_v31 = vld [vmem:[%s3819_s0 + $0x64] ss:$8 sps:$4 sm:$0xff]  }
   0xc   :  { %507 = vmatprep.subr.bf16.mxu0 %v2622_v6  ;;  %v2706_v32 = vld [vmem:[%s3820_s3 + $0x74] ss:$8 sps:$4 sm:$0xff]   ;;  %v2708_v33 = vld [vmem:[%s3820_s3 + $0x70] ss:$8 sps:$4 sm:$0xff]   ;;  %v2709_v34 = vld [vmem:[%s3820_s3 + $0x64] ss:$8 sps:$4 sm:$0xff]  }
   0xd   :  { %1254 = vmatprep.subr.bf16.mxu1 %v2706_v32  ;;  %v2660_v35 = vld [vmem:[%s3819_s0 + $0x60] ss:$8 sps:$4 sm:$0xff]   ;;  %v2712_v37 = vld [vmem:[%s3820_s3 + $0x54] ss:$8 sps:$4 sm:$0xff]   ;;  %v2714_v39 = vld [vmem:[%s3820_s3 + $0x50] ss:$8 sps:$4 sm:$0xff]  }
   0xe   :  { %1255 = vmatpush1.bf16.msra.mxu1 %v2708_v33  ;;  %v2711_v36 = vld [vmem:[%s3820_s3 + $0x60] ss:$8 sps:$4 sm:$0xff]   ;;  %v2661_v38 = vld [vmem:[%s3819_s0 + $0x74] ss:$8 sps:$4 sm:$0xff]   ;;  %v2715_v40 = vld [vmem:[%s3820_s3 + $0x44] ss:$8 sps:$4 sm:$0xff]  }
   0xf   :  { %508 = vmatpush1.bf16.msra.mxu0 %v2624_v7  ;;  %1256 = vmatprep.subr.bf16.mxu1 %v2709_v34  ;;  %v2717_v41 = vld [vmem:[%s3820_s3 + $0x40] ss:$8 sps:$4 sm:$0xff]   ;;  %v2663_v42 = vld [vmem:[%s3819_s0 + $0x70] ss:$8 sps:$4 sm:$0xff]   ;;  %v2718_v43 = vld [vmem:[%s3820_s3 + $0x34] ss:$8 sps:$4 sm:$0xff]  }
  0x10   :  { %509 = vmatprep.subr.bf16.mxu0 %v2625_v8  ;;  %v2664_v44 = vld [vmem:[%s3819_s0 + $0x84] ss:$8 sps:$4 sm:$0xff]   ;;  %v2720_v45 = vld [vmem:[%s3820_s3 + $0x30] ss:$8 sps:$4 sm:$0xff]   ;;  %v2723_v47 = vld [vmem:[%s3820_s3 + $0x20] ss:$8 sps:$4 sm:$0xff]  }
  0x11   :  { %v2721_v46 = vld [vmem:[%s3820_s3 + $0x24] ss:$8 sps:$4 sm:$0xff]   ;;  %v2666_v48 = vld [vmem:[%s3819_s0 + $0x80] ss:$8 sps:$4 sm:$0xff]   ;;  %v2667_v49 = vld [vmem:[%s3819_s0 + $0x94] ss:$8 sps:$4 sm:$0xff]  }
  0x12   :  { %1257 = vmatpush1.bf16.msra.mxu1 %v2711_v36  ;;  %v2724_v50 = vld [vmem:[%s3820_s3 + $0x14] ss:$8 sps:$4 sm:$0xff]   ;;  %v2726_v51 = vld [vmem:[%s3820_s3 + $0x10] ss:$8 sps:$4 sm:$0xff]   ;;  %v2727_v53 = vld [vmem:[%s3820_s3 + $0x4] ss:$8 sps:$4 sm:$0xff]  }
  0x13   :  { %510 = vmatpush1.bf16.msra.mxu0 %v2627_v10  ;;  %1258 = vmatprep.subr.bf16.mxu1 %v2712_v37  ;;  %v2669_v52 = vld [vmem:[%s3819_s0 + $0x90] ss:$8 sps:$4 sm:$0xff]   ;;  %v2670_v54 = vld [vmem:[%s3819_s0 + $0xa4] ss:$8 sps:$4 sm:$0xff]   ;;  %v2729_v55 = vld [vmem:[%s3820_s3] ss:$8 sps:$4 sm:$0xff]  }
  0x14   :  { %511 = vmatprep.subr.bf16.mxu0 %v2628_v11  ;;  %v2730_v56 = vld [vmem:[%s3820_s3 + $0xf4] ss:$8 sps:$4 sm:$0xff]   ;;  %v2732_v57 = vld [vmem:[%s3820_s3 + $0xf0] ss:$8 sps:$4 sm:$0xff]   ;;  %v2672_v58 = vld [vmem:[%s3819_s0 + $0xa0] ss:$8 sps:$4 sm:$0xff]  }
  0x15   :  { %v2733_v59 = vld [vmem:[%s3820_s3 + $0xe4] ss:$8 sps:$4 sm:$0xff]   ;;  %v2673_v60 = vld [vmem:[%s3819_s0 + $0xb4] ss:$8 sps:$4 sm:$0xff]   ;;  %v2735_v61 = vld [vmem:[%s3820_s3 + $0xe0] ss:$8 sps:$4 sm:$0xff]  }
  0x16   :  { %1259 = vmatpush1.bf16.msra.mxu1 %v2714_v39  ;;  %v2736_v62 = vld [vmem:[%s3820_s3 + $0xd4] ss:$8 sps:$4 sm:$0xff]   ;;  %v2738_v63 = vld [vmem:[%s3820_s3 + $0xd0] ss:$8 sps:$4 sm:$0xff]   ;;  %v2739_v1 = vld [vmem:[%s3820_s3 + $0xc4] ss:$8 sps:$4 sm:$0xff]  }
  0x17   :  { %512 = vmatpush1.bf16.msra.mxu0 %v2630_v12  ;;  %1260 = vmatprep.subr.bf16.mxu1 %v2715_v40  ;;  %v2675_v0 = vld [vmem:[%s3819_s0 + $0xb0] ss:$8 sps:$4 sm:$0xff]   ;;  %v2676_v2 = vld [vmem:[%s3819_s0 + $0xc4] ss:$8 sps:$4 sm:$0xff]   ;;  %v2741_v3 = vld [vmem:[%s3820_s3 + $0xc0] ss:$8 sps:$4 sm:$0xff]  }
  0x18   :  { %513 = vmatprep.subr.bf16.mxu0 %v2631_v13  ;;  %v2742_v4 = vld [vmem:[%s3820_s3 + $0xb4] ss:$8 sps:$4 sm:$0xff]   ;;  %v2744_v5 = vld [vmem:[%s3820_s3 + $0xb0] ss:$8 sps:$4 sm:$0xff]   ;;  %v2678_v6 = vld [vmem:[%s3819_s0 + $0xc0] ss:$8 sps:$4 sm:$0xff]  }
  0x19   :  { %v2745_v7 = vld [vmem:[%s3820_s3 + $0xa4] ss:$8 sps:$4 sm:$0xff]   ;;  %v2679_v8 = vld [vmem:[%s3819_s0 + $0xd4] ss:$8 sps:$4 sm:$0xff]   ;;  %v2747_v9 = vld [vmem:[%s3820_s3 + $0xa0] ss:$8 sps:$4 sm:$0xff]  }
  0x1a   :  { %1261 = vmatpush1.bf16.msra.mxu1 %v2717_v41  ;;  %v2750_v10 = vld [vmem:[%s3820_s3 + $0x94] ss:$8 sps:$4 sm:$0xff]   ;;  %v2753_v11 = vld [vmem:[%s3820_s3 + $0x90] ss:$8 sps:$4 sm:$0xff]   ;;  %v2754_v13 = vld [vmem:[%s3820_s3 + $0x84] ss:$8 sps:$4 sm:$0xff]  }
  0x1b   :  { %514 = vmatpush1.bf16.msra.mxu0 %v2633_v14  ;;  %1262 = vmatprep.subr.bf16.mxu1 %v2718_v43  ;;  %v2681_v12 = vld [vmem:[%s3819_s0 + $0xd0] ss:$8 sps:$4 sm:$0xff]   ;;  %v2682_v14 = vld [vmem:[%s3819_s0 + $0xe4] ss:$8 sps:$4 sm:$0xff]   ;;  %v2752_v32 = vld [vmem:[%s3819_s0 + $0x160] ss:$8 sps:$4 sm:$0xff]  }
  0x1c   :  { %515 = vmatprep.subr.bf16.mxu0 %v2634_v15  ;;  %v2756_v15 = vld [vmem:[%s3820_s3 + $0x80] ss:$8 sps:$4 sm:$0xff]   ;;  %v2687_v18 = vld [vmem:[%s3819_s0 + $0xf0] ss:$8 sps:$4 sm:$0xff]   ;;  %v2757_v33 = vld [vmem:[%s3819_s0 + $0x174] ss:$8 sps:$4 sm:$0xff]  }
  0x1d   :  { %v2759_v34 = vld [vmem:[%s3819_s0 + $0x170] ss:$8 sps:$4 sm:$0xff]  }
  0x1e   :  { %1263 = vmatpush1.bf16.msra.mxu1 %v2720_v45 }
  0x1f   :  { %516 = vmatpush1.bf16.msra.mxu0 %v2636_v16  ;;  %1264 = vmatprep.subr.bf16.mxu1 %v2721_v46  ;;  %v2684_v16 = vld [vmem:[%s3819_s0 + $0xe0] ss:$8 sps:$4 sm:$0xff]  }
  0x20   :  { %2347 = vmatprep.subr.msk.bf16.mxu0 %vm494_vm1, %v2637_v17  ;;  %v2685_v17 = vld [vmem:[%s3819_s0 + $0xf4] ss:$8 sps:$4 sm:$0xff]  }
  0x22   :  { %1265 = vmatpush1.bf16.msra.mxu1 %v2723_v47 }
  0x23   :  { %532 = vmatpush2.bf16.msra.mxu0 %v496_v19  ;;  %1266 = vmatprep.subr.bf16.mxu1 %v2724_v50  ;;  %v2688_v19 = vld [vmem:[%s3819_s0 + $0x104] ss:$8 sps:$4 sm:$0xff]  }
  0x26   :  { %534 = vmatmul.mubr.bf16.vlgmr.msra.gmra.mxu0 %v2640_v20  ;;  %1267 = vmatpush1.bf16.msra.mxu1 %v2726_v51  ;;  %v2690_v20 = vld [vmem:[%s3819_s0 + $0x100] ss:$8 sps:$4 sm:$0xff]  }
  0x27   :  { %2349 = vmatprep.mubr.msk.bf16.mxu0 %vm421_vm0, %v2643_v21  ;;  %1268 = vmatprep.subr.bf16.mxu1 %v2727_v53  ;;  %v2691_v21 = vld [vmem:[%s3819_s0 + $0x114] ss:$8 sps:$4 sm:$0xff]   ;;  %v105_v51 = vld [vmem:[%s3821_s2] sm:$0x3] }
  0x2a   :  { %1269 = vmatpush1.bf16.msra.mxu1 %v2729_v55 }
  0x2b   :  { %1270 = vmatprep.subr.bf16.mxu1 %v2730_v56 }
  0x2e   :  { %544 = vmatmul.mubr.bf16.gmra.mxu0 %v2645_v22  ;;  %1271 = vmatpush2.bf16.msra.mxu1 %v2732_v57  ;;  %v2693_v22 = vld [vmem:[%s3819_s0 + $0x110] ss:$8 sps:$4 sm:$0xff]  }
  0x2f   :  { %2350 = vmatprep.mubr.msk.bf16.mxu0 %vm421_vm0, %v2646_v23  ;;  %1272 = vmatprep.subr.bf16.mxu1 %v2733_v59  ;;  %v2694_v23 = vld [vmem:[%s3819_s0 + $0x124] ss:$8 sps:$4 sm:$0xff]  }
  0x32   :  { %1273 = vmatpush2.bf16.msra.mxu1 %v2735_v61 }
  0x33   :  { %1274 = vmatprep.subr.bf16.mxu1 %v2736_v62 }
  0x36   :  { %554 = vmatmul.mubr.bf16.gmra.mxu0 %v2648_v24  ;;  %1275 = vmatpush2.bf16.msra.mxu1 %v2738_v63  ;;  %v2696_v24 = vld [vmem:[%s3819_s0 + $0x120] ss:$8 sps:$4 sm:$0xff]  }
  0x37   :  { %2351 = vmatprep.mubr.msk.bf16.mxu0 %vm421_vm0, %v2649_v25  ;;  %1276 = vmatprep.subr.bf16.mxu1 %v2739_v1  ;;  %v2697_v25 = vld [vmem:[%s3819_s0 + $0x134] ss:$8 sps:$4 sm:$0xff]  }
  0x3a   :  { %1277 = vmatpush2.bf16.msra.mxu1 %v2741_v3 }
  0x3b   :  { %1278 = vmatprep.subr.bf16.mxu1 %v2742_v4 }
  0x3e   :  { %564 = vmatmul.mubr.bf16.gmra.mxu0 %v2651_v26  ;;  %1279 = vmatpush2.bf16.msra.mxu1 %v2744_v5  ;;  %v2699_v26 = vld [vmem:[%s3819_s0 + $0x130] ss:$8 sps:$4 sm:$0xff]  }
  0x3f   :  { %2352 = vmatprep.mubr.msk.bf16.mxu0 %vm421_vm0, %v2652_v27  ;;  %1280 = vmatprep.subr.bf16.mxu1 %v2745_v7  ;;  %v2700_v27 = vld [vmem:[%s3819_s0 + $0x144] ss:$8 sps:$4 sm:$0xff]  }
  0x42   :  { %1281 = vmatpush2.bf16.msra.mxu1 %v2747_v9 }
  0x43   :  { %1282 = vmatprep.subr.bf16.mxu1 %v2750_v10 }
  0x46   :  { %574 = vmatmul.mubr.bf16.gmra.mxu0 %v2654_v28  ;;  %1283 = vmatpush2.bf16.msra.mxu1 %v2753_v11  ;;  %v2702_v28 = vld [vmem:[%s3819_s0 + $0x140] ss:$8 sps:$4 sm:$0xff]  }
  0x47   :  { %2353 = vmatprep.mubr.msk.bf16.mxu0 %vm421_vm0, %v2655_v29  ;;  %1284 = vmatprep.subr.bf16.mxu1 %v2754_v13  ;;  %v2703_v29 = vld [vmem:[%s3819_s0 + $0x154] ss:$8 sps:$4 sm:$0xff]  }
  0x4a   :  { %1285 = vmatpush2.bf16.msra.mxu1 %v2756_v15 }
  0x4e   :  { %584 = vmatmul.mubr.bf16.gmra.mxu0 %v2657_v30  ;;  %v2705_v30 = vld [vmem:[%s3819_s0 + $0x150] ss:$8 sps:$4 sm:$0xff]  }
  0x4f   :  { %2354 = vmatprep.mubr.msk.bf16.mxu0 %vm421_vm0, %v2658_v31  ;;  %v2748_v31 = vld [vmem:[%s3819_s0 + $0x164] ss:$8 sps:$4 sm:$0xff]  }
  0x56   :  { %594 = vmatmul.mubr.bf16.gmra.mxu0 %v2660_v35  ;;  %v2762_v35 = vld [vmem:[%s3820_s3 + $0x174] ss:$8 sps:$4 sm:$0xff]  }
  0x57   :  { %2355 = vmatprep.mubr.msk.bf16.mxu0 %vm421_vm0, %v2661_v38  ;;  %1387 = vmatprep.subr.bf16.mxu1 %v2762_v35 }
  0x5e   :  { %604 = vmatmul.mubr.bf16.gmra.mxu0 %v2663_v42  ;;  %v107_v42 = vlaneseq }
  0x5f   :  { %2356 = vmatprep.mubr.msk.bf16.mxu0 %vm421_vm0, %v2664_v44 }
  0x60   :  { %v3224_v45 = vshrl.u32 %v107_v42, 7 }
  0x62   :  { %v113_v47 = vsub.s32 1, %v3224_v45 }
  0x66   :  { %614 = vmatmul.mubr.bf16.gmra.mxu0 %v2666_v48 }
  0x67   :  { %2357 = vmatprep.mubr.msk.bf16.mxu0 %vm421_vm0, %v2667_v49  ;;  %v109_v49 = vsub.s32 0, %v3224_v45 }
  0x6e   :  { %624 = vmatmul.mubr.bf16.gmra.mxu0 %v2669_v52  ;;  %v3233_v52 = vrot.slane %v105_v51, %v113_v47 }
  0x6f   :  { %2358 = vmatprep.mubr.msk.bf16.mxu0 %vm421_vm0, %v2670_v54  ;;  %v3237_v54 = vrot.slane %v105_v51, %v109_v49 }
  0x76   :  { %634 = vmatmul.mubr.bf16.gmra.mxu0 %v2672_v58 }
  0x77   :  { %2359 = vmatprep.mubr.msk.bf16.mxu0 %vm421_vm0, %v2673_v60 }
  0x7e   :  { %644 = vmatmul.mubr.bf16.gmra.mxu0 %v2675_v0 }
  0x7f   :  { %2360 = vmatprep.mubr.msk.bf16.mxu0 %vm421_vm0, %v2676_v2 }
  0x86   :  { %654 = vmatmul.mubr.bf16.gmra.mxu0 %v2678_v6 }
  0x87   :  { %2361 = vmatprep.mubr.msk.bf16.mxu0 %vm421_vm0, %v2679_v8 }
  0x8e   :  { %664 = vmatmul.mubr.bf16.gmra.mxu0 %v2681_v12 }
  0x8f   :  { %2362 = vmatprep.mubr.msk.bf16.mxu0 %vm421_vm0, %v2682_v14 }
  0x96   :  { %674 = vmatmul.mubr.bf16.gmra.mxu0 %v2684_v16 }
  0x97   :  { %2363 = vmatprep.mubr.msk.bf16.mxu0 %vm421_vm0, %v2685_v17 }
  0x9e   :  { %684 = vmatmul.mubr.bf16.gmra.mxu0 %v2687_v18 }
  0x9f   :  { %2364 = vmatprep.mubr.msk.bf16.mxu0 %vm421_vm0, %v2688_v19 }
  0xa6   :  { %694 = vmatmul.mubr.bf16.gmra.mxu0 %v2690_v20 }
  0xa7   :  { %2365 = vmatprep.mubr.msk.bf16.mxu0 %vm421_vm0, %v2691_v21 }
  0xae   :  { %704 = vmatmul.mubr.bf16.gmra.mxu0 %v2693_v22 }
  0xaf   :  { %2366 = vmatprep.mubr.msk.bf16.mxu0 %vm421_vm0, %v2694_v23 }
  0xb6   :  { %714 = vmatmul.mubr.bf16.gmra.mxu0 %v2696_v24 }
  0xb7   :  { %2367 = vmatprep.mubr.msk.bf16.mxu0 %vm421_vm0, %v2697_v25 }
  0xbe   :  { %724 = vmatmul.mubr.bf16.gmra.mxu0 %v2699_v26 }
  0xbf   :  { %2368 = vmatprep.mubr.msk.bf16.mxu0 %vm421_vm0, %v2700_v27 }
  0xc6   :  { %734 = vmatmul.mubr.bf16.gmra.mxu0 %v2702_v28 }
  0xc7   :  { %2369 = vmatprep.mubr.msk.bf16.mxu0 %vm421_vm0, %v2703_v29 }
  0xce   :  { %744 = vmatmul.mubr.bf16.gmra.mxu0 %v2705_v30 }
  0xcf   :  { %2370 = vmatprep.mubr.msk.bf16.mxu0 %vm421_vm0, %v2748_v31 }
  0xd6   :  { %754 = vmatmul.mubr.bf16.gmra.mxu0 %v2752_v32 }
  0xd7   :  { %2371 = vmatprep.mubr.msk.bf16.mxu0 %vm421_vm0, %v2757_v33 }
  0xde   :  { %764 = vmatmul.mubr.bf16.gmra.mxu0 %v2759_v34 }
  0xe6   :  { %v535_v36 = vpop.f32.mrf.mxu0 }
  0xe7   :  { %v536_v7 = vadd.f32 %v535_v36, %v3237_v54 }
  0xe8   :  { %v537_v37 = vpop.f32.mrf.mxu0 }
  0xe9   :  { %v538_v57 = vadd.f32 %v537_v37, %v3233_v52  ;;  %v774_v29 = vmax.f32 %v536_v7, 0.0 }
  0xea   :  { %v539_v38 = vpop.f32.mrf.mxu0 }
  0xeb   :  { %v540_v2 = vadd.f32 %v539_v38, %v3237_v54  ;;  %v775_v11 = vmax.f32 %v538_v57, 0.0 }
  0xec   :  { %v541_v39 = vpop.f32.mrf.mxu0 }
  0xed   :  { %v542_v58 = vadd.f32 %v541_v39, %v3233_v52  ;;  %v776_v20 = vmax.f32 %v540_v2, 0.0  ;;  %v870_v36 = vmax.f32 %v774_v29, %v775_v11 }
  0xee   :  { %v545_v40 = vpop.f32.mrf.mxu0 }
  0xef   :  { %v546_v3 = vadd.f32 %v545_v40, %v3237_v54  ;;  %v777_v12 = vmax.f32 %v542_v58, 0.0  ;;  %v2763_v58 = vld [vmem:[%s3820_s3 + $0x160] ss:$8 sps:$4 sm:$0xff]  }
  0xf0   :  { %v547_v41 = vpop.f32.mrf.mxu0 }
  0xf1   :  { %v548_v59 = vadd.f32 %v547_v41, %v3233_v52  ;;  %v778_v21 = vmax.f32 %v546_v3, 0.0  ;;  %v871_v30 = vmax.f32 %v776_v20, %v777_v12  ;;  %v2774_v20 = vld [vmem:[%s3820_s3 + $0x134] ss:$8 sps:$4 sm:$0xff]  }
  0xf2   :  { %v549_v43 = vpop.f32.mrf.mxu0 }
  0xf3   :  { %v550_v60 = vadd.f32 %v549_v43, %v3237_v54  ;;  %v779_v13 = vmax.f32 %v548_v59, 0.0 }
  0xf4   :  { %v551_v44 = vpop.f32.mrf.mxu0 }
  0xf5   :  { %v552_v55 = vadd.f32 %v551_v44, %v3233_v52  ;;  %v780_v14 = vmax.f32 %v550_v60, 0.0  ;;  %v872_v31 = vmax.f32 %v778_v21, %v779_v13  ;;  %v2760_v44 = vld [vmem:[%s3820_s3 + $0x170] ss:$8 sps:$4 sm:$0xff]  }
  0xf6   :  { %v555_v46 = vpop.f32.mrf.mxu0 }
  0xf7   :  { %v781_v4 = vmax.f32 %v552_v55, 0.0  ;;  %v556_v5 = vadd.f32 %v555_v46, %v3237_v54  ;;  %v918_v41 = vmax.f32 %v870_v36, %v872_v31  ;;  %v2780_v36 = vld [vmem:[%s3820_s3 + $0x114] ss:$8 sps:$4 sm:$0xff]  }
  0xf8   :  { %v557_v48 = vpop.f32.mrf.mxu0 }
  0xf9   :  { %v558_v62 = vadd.f32 %v557_v48, %v3233_v52  ;;  %v873_v22 = vmax.f32 %v780_v14, %v781_v4  ;;  %v782_v23 = vmax.f32 %v556_v5, 0.0 }
  0xfa   :  { %v559_v50 = vpop.f32.mrf.mxu0 }
  0xfb   :  { %v560_v8 = vadd.f32 %v559_v50, %v3237_v54  ;;  %v783_v16 = vmax.f32 %v558_v62, 0.0  ;;  %v919_v37 = vmax.f32 %v871_v30, %v873_v22  ;;  %v2765_v50 = vld [vmem:[%s3820_s3 + $0x164] ss:$8 sps:$4 sm:$0xff]  }
  0xfc   :  { %v561_v53 = vpop.f32.mrf.mxu0 }
  0xfd   :  { %v562_v63 = vadd.f32 %v561_v53, %v3233_v52  ;;  %v784_v25 = vmax.f32 %v560_v8, 0.0  ;;  %v874_v33 = vmax.f32 %v782_v23, %v783_v16  ;;  %v942_v48 = vpack.c.bf16 %v919_v37, %v918_v41 }
  0xfe   :  { %v565_v56 = vpop.f32.mrf.mxu0 }
  0xff   :  { %v566_v0 = vadd.f32 %v565_v56, %v3237_v54  ;;  %v785_v17 = vmax.f32 %v562_v63, 0.0 }
 0x100   :  { %v567_v61 = vpop.f32.mrf.mxu0 }
 0x101   :  { %v568_v1 = vadd.f32 %v567_v61, %v3233_v52  ;;  %v786_v18 = vmax.f32 %v566_v0, 0.0  ;;  %v875_v34 = vmax.f32 %v784_v25, %v785_v17  ;;  %v2768_v61 = vld [vmem:[%s3820_s3 + $0x154] ss:$8 sps:$4 sm:$0xff]   ;;  %v2772_v25 = vld [vmem:[%s3820_s3 + $0x130] ss:$8 sps:$4 sm:$0xff]  }
 0x102   :  { %v569_v6 = vpop.f32.mrf.mxu0 }
 0x103   :  { %v787_v9 = vmax.f32 %v568_v1, 0.0  ;;  %v570_v10 = vadd.f32 %v569_v6, %v3237_v54  ;;  %v2766_v6 = vld [vmem:[%s3820_s3 + $0x150] ss:$8 sps:$4 sm:$0xff]  }
 0x104   :  { %v571_v15 = vpop.f32.mrf.mxu0 }
 0x105   :  { %v572_v19 = vadd.f32 %v571_v15, %v3233_v52  ;;  %v876_v26 = vmax.f32 %v786_v18, %v787_v9  ;;  %v788_v27 = vmax.f32 %v570_v10, 0.0  ;;  %v2771_v9 = vld [vmem:[%s3820_s3 + $0x144] ss:$8 sps:$4 sm:$0xff]   ;;  %v2769_v18 = vld [vmem:[%s3820_s3 + $0x140] ss:$8 sps:$4 sm:$0xff]  }
 0x106   :  { %v575_v24 = vpop.f32.mrf.mxu0 }
 0x107   :  { %v789_v28 = vmax.f32 %v572_v19, 0.0  ;;  %v920_v39 = vmax.f32 %v874_v33, %v876_v26  ;;  %v576_v59 = vadd.f32 %v575_v24, %v3237_v54  ;;  %v2775_v33 = vld [vmem:[%s3820_s3 + $0x120] ss:$8 sps:$4 sm:$0xff]  }
 0x108   :  { %v577_v32 = vpop.f32.mrf.mxu0 }
 0x109   :  { %v877_v35 = vmax.f32 %v788_v27, %v789_v28  ;;  %v578_v53 = vadd.f32 %v577_v32, %v3233_v52  ;;  %v790_v7 = vmax.f32 %v576_v59, 0.0  ;;  %v2777_v27 = vld [vmem:[%s3820_s3 + $0x124] ss:$8 sps:$4 sm:$0xff]  }
 0x10a   :  { %v579_v38 = vpop.f32.mrf.mxu0 }
 0x10b   :  { %v921_v40 = vmax.f32 %v875_v34, %v877_v35  ;;  %v580_v62 = vadd.f32 %v579_v38, %v3237_v54  ;;  %v791_v2 = vmax.f32 %v578_v53, 0.0 }
 0x10c   :  { %v581_v42 = vpop.f32.mrf.mxu0 }
 0x10d   :  { %v943_v43 = vpack.c.bf16 %v921_v40, %v920_v39  ;;  %v582_v55 = vadd.f32 %v581_v42, %v3233_v52  ;;  %v792_v10 = vmax.f32 %v580_v62, 0.0  ;;  %v878_v15 = vmax.f32 %v790_v7, %v791_v2  ;;  %v2781_v62 = vld [vmem:[%s3820_s3 + $0x100] ss:$8 sps:$4 sm:$0xff]  }
 0x10e   :  { %v585_v46 = vpop.f32.mrf.mxu0 }
 0x10f   :  { %1286 = vmatprep.mubr.bf16.mxu1 %v943_v43  ;;  %v586_v56 = vadd.f32 %v585_v46, %v3237_v54  ;;  %v793_v3 = vmax.f32 %v582_v55, 0.0  ;;  %v2778_v46 = vld [vmem:[%s3820_s3 + $0x110] ss:$8 sps:$4 sm:$0xff]  }
 0x110   :  { %v587_v51 = vpop.f32.mrf.mxu0  ;;  %1287 = vmatmul.mubr.bf16.vlgmr.msra.gmra.mxu1 %v942_v48 }
 0x111   :  { %v588_v57 = vadd.f32 %v587_v51, %v3233_v52  ;;  %1388 = vmatpush1.bf16.msra.mxu1 %v2760_v44  ;;  %v794_v4 = vmax.f32 %v586_v56, 0.0  ;;  %v879_v16 = vmax.f32 %v792_v10, %v793_v3  ;;  %v2783_v51 = vld [vmem:[%s3820_s3 + $0x104] ss:$8 sps:$4 sm:$0xff]  }
 0x112   :  { %v589_v60 = vpop.f32.mrf.mxu0  ;;  %1389 = vmatprep.subr.bf16.mxu1 %v2765_v50 }
 0x113   :  { %v795_v63 = vmax.f32 %v588_v57, 0.0  ;;  %v590_v0 = vadd.f32 %v589_v60, %v3237_v54 }
 0x114   :  { %v591_v1 = vpop.f32.mrf.mxu0 }
 0x115   :  { %v592_v5 = vadd.f32 %v591_v1, %v3233_v52  ;;  %1390 = vmatpush1.bf16.msra.mxu1 %v2763_v58  ;;  %v880_v11 = vmax.f32 %v794_v4, %v795_v63  ;;  %v796_v12 = vmax.f32 %v590_v0, 0.0 }
 0x116   :  { %v595_v8 = vpop.f32.mrf.mxu0  ;;  %1391 = vmatprep.subr.bf16.mxu1 %v2768_v61 }
 0x117   :  { %v797_v13 = vmax.f32 %v592_v5, 0.0  ;;  %v922_v21 = vmax.f32 %v878_v15, %v880_v11  ;;  %v596_v34 = vadd.f32 %v595_v8, %v3237_v54 }
 0x118   :  { %v597_v14 = vpop.f32.mrf.mxu0 }
 0x119   :  { %v881_v17 = vmax.f32 %v796_v12, %v797_v13  ;;  %1392 = vmatpush1.bf16.msra.mxu1 %v2766_v6  ;;  %v598_v29 = vadd.f32 %v597_v14, %v3233_v52  ;;  %v798_v48 = vmax.f32 %v596_v34, 0.0 }
 0x11a   :  { %v599_v19 = vpop.f32.mrf.mxu0  ;;  %1393 = vmatprep.subr.bf16.mxu1 %v2771_v9 }
 0x11b   :  { %v923_v22 = vmax.f32 %v879_v16, %v881_v17  ;;  %v600_v37 = vadd.f32 %v599_v19, %v3237_v54  ;;  %v799_v41 = vmax.f32 %v598_v29, 0.0 }
 0x11c   :  { %v601_v23 = vpop.f32.mrf.mxu0 }
 0x11d   :  { %v3287_v24 = vpack.c.bf16 %v923_v22, %v922_v21  ;;  %1394 = vmatpush1.bf16.msra.mxu1 %v2769_v18  ;;  %v602_v30 = vadd.f32 %v601_v23, %v3233_v52  ;;  %v800_v53 = vmax.f32 %v600_v37, 0.0  ;;  %v882_v59 = vmax.f32 %v798_v48, %v799_v41 }
 0x11e   :  { %v605_v26 = vpop.f32.mrf.mxu0  ;;  %1395 = vmatprep.subr.bf16.mxu1 %v2774_v20 }
 0x11f   :  { %1296 = vmatprep.mubr.bf16.mxu1 %v3287_v24  ;;  %v606_v31 = vadd.f32 %v605_v26, %v3237_v54  ;;  %v801_v42 = vmax.f32 %v602_v30, 0.0 }
 0x120   :  { %v607_v28 = vpop.f32.mrf.mxu0  ;;  %1297 = vmatmul.mubr.bf16.gmra.mxu1 %v943_v43 }
 0x121   :  { %v608_v32 = vadd.f32 %v607_v28, %v3233_v52  ;;  %1396 = vmatpush1.bf16.msra.mxu1 %v2772_v25  ;;  %v802_v43 = vmax.f32 %v606_v31, 0.0  ;;  %v883_v60 = vmax.f32 %v800_v53, %v801_v42 }
 0x122   :  { %v609_v35 = vpop.f32.mrf.mxu0  ;;  %1397 = vmatprep.subr.bf16.mxu1 %v2777_v27 }
 0x123   :  { %v803_v38 = vmax.f32 %v608_v32, 0.0  ;;  %v610_v39 = vadd.f32 %v609_v35, %v3237_v54 }
 0x124   :  { %v611_v40 = vpop.f32.mrf.mxu0 }
 0x125   :  { %v612_v44 = vadd.f32 %v611_v40, %v3233_v52  ;;  %1398 = vmatpush1.bf16.msra.mxu1 %v2775_v33  ;;  %v884_v55 = vmax.f32 %v802_v43, %v803_v38  ;;  %v804_v56 = vmax.f32 %v610_v39, 0.0 }
 0x126   :  { %v615_v50 = vpop.f32.mrf.mxu0  ;;  %1399 = vmatprep.subr.bf16.mxu1 %v2780_v36 }
 0x127   :  { %v805_v57 = vmax.f32 %v612_v44, 0.0  ;;  %v924_v0 = vmax.f32 %v882_v59, %v884_v55  ;;  %v616_v10 = vadd.f32 %v615_v50, %v3237_v54 }
 0x128   :  { %v617_v58 = vpop.f32.mrf.mxu0 }
 0x129   :  { %v885_v61 = vmax.f32 %v804_v56, %v805_v57  ;;  %1400 = vmatpush1.bf16.msra.mxu1 %v2778_v46  ;;  %v618_v6 = vadd.f32 %v617_v58, %v3233_v52  ;;  %v806_v20 = vmax.f32 %v616_v10, 0.0 }
 0x12a   :  { %v619_v63 = vpop.f32.mrf.mxu0  ;;  %1401 = vmatprep.subr.bf16.mxu1 %v2783_v51 }
 0x12b   :  { %v925_v1 = vmax.f32 %v883_v60, %v885_v61  ;;  %v620_v12 = vadd.f32 %v619_v63, %v3237_v54  ;;  %v807_v16 = vmax.f32 %v618_v6, 0.0 }
 0x12c   :  { %v621_v2 = vpop.f32.mrf.mxu0 }
 0x12d   :  { %v3319_v3 = vpack.c.bf16 %v925_v1, %v924_v0  ;;  %1402 = vmatpush1.bf16.msra.mxu1 %v2781_v62  ;;  %v622_v7 = vadd.f32 %v621_v2, %v3233_v52  ;;  %v808_v22 = vmax.f32 %v620_v12, 0.0  ;;  %v886_v28 = vmax.f32 %v806_v20, %v807_v16 }
 0x12e   :  { %v625_v4 = vpop.f32.mrf.mxu0 }
 0x12f   :  { %1306 = vmatprep.mubr.bf16.mxu1 %v3319_v3  ;;  %v626_v8 = vadd.f32 %v625_v4, %v3237_v54  ;;  %v809_v17 = vmax.f32 %v622_v7, 0.0 }
 0x130   :  { %v627_v5 = vpop.f32.mrf.mxu0  ;;  %1307 = vmatmul.mubr.bf16.gmra.mxu1 %v3287_v24 }
 0x131   :  { %v628_v9 = vadd.f32 %v627_v5, %v3233_v52  ;;  %v810_v18 = vmax.f32 %v626_v8, 0.0  ;;  %v887_v29 = vmax.f32 %v808_v22, %v809_v17 }
 0x132   :  { %v629_v11 = vpop.f32.mrf.mxu0 }
 0x133   :  { %v811_v13 = vmax.f32 %v628_v9, 0.0  ;;  %v630_v14 = vadd.f32 %v629_v11, %v3237_v54 }
 0x134   :  { %v631_v15 = vpop.f32.mrf.mxu0 }
 0x135   :  { %v632_v19 = vadd.f32 %v631_v15, %v3233_v52  ;;  %v888_v23 = vmax.f32 %v810_v18, %v811_v13  ;;  %v812_v25 = vmax.f32 %v630_v14, 0.0 }
 0x136   :  { %v635_v21 = vpop.f32.mrf.mxu0 }
 0x137   :  { %v813_v26 = vmax.f32 %v632_v19, 0.0  ;;  %v926_v32 = vmax.f32 %v886_v28, %v888_v23  ;;  %v636_v42 = vadd.f32 %v635_v21, %v3237_v54 }
 0x138   :  { %v637_v27 = vpop.f32.mrf.mxu0 }
 0x139   :  { %v889_v30 = vmax.f32 %v812_v25, %v813_v26  ;;  %v638_v38 = vadd.f32 %v637_v27, %v3233_v52  ;;  %v814_v57 = vmax.f32 %v636_v42, 0.0 }
 0x13a   :  { %v639_v31 = vpop.f32.mrf.mxu0 }
 0x13b   :  { %v927_v33 = vmax.f32 %v887_v29, %v889_v30  ;;  %v640_v44 = vadd.f32 %v639_v31, %v3237_v54  ;;  %v815_v51 = vmax.f32 %v638_v38, 0.0 }
 0x13c   :  { %v641_v34 = vpop.f32.mrf.mxu0 }
 0x13d   :  { %v3331_v35 = vpack.c.bf16 %v927_v33, %v926_v32  ;;  %v642_v39 = vadd.f32 %v641_v34, %v3233_v52  ;;  %v816_v59 = vmax.f32 %v640_v44, 0.0  ;;  %v890_v0 = vmax.f32 %v814_v57, %v815_v51 }
 0x13e   :  { %v645_v36 = vpop.f32.mrf.mxu0 }
 0x13f   :  { %1316 = vmatprep.mubr.bf16.mxu1 %v3331_v35  ;;  %v646_v40 = vadd.f32 %v645_v36, %v3237_v54  ;;  %v817_v53 = vmax.f32 %v642_v39, 0.0 }
 0x140   :  { %v647_v37 = vpop.f32.mrf.mxu0  ;;  %1317 = vmatmul.mubr.bf16.gmra.mxu1 %v3319_v3 }
 0x141   :  { %v648_v41 = vadd.f32 %v647_v37, %v3233_v52  ;;  %v818_v55 = vmax.f32 %v646_v40, 0.0  ;;  %v891_v1 = vmax.f32 %v816_v59, %v817_v53 }
 0x142   :  { %v649_v43 = vpop.f32.mrf.mxu0 }
 0x143   :  { %v819_v46 = vmax.f32 %v648_v41, 0.0  ;;  %v650_v48 = vadd.f32 %v649_v43, %v3237_v54 }
 0x144   :  { %v651_v50 = vpop.f32.mrf.mxu0 }
 0x145   :  { %v652_v56 = vadd.f32 %v651_v50, %v3233_v52  ;;  %v892_v60 = vmax.f32 %v818_v55, %v819_v46  ;;  %v820_v61 = vmax.f32 %v650_v48, 0.0 }
 0x146   :  { %v655_v58 = vpop.f32.mrf.mxu0 }
 0x147   :  { %v821_v62 = vmax.f32 %v652_v56, 0.0  ;;  %v928_v5 = vmax.f32 %v890_v0, %v892_v60  ;;  %v656_v15 = vadd.f32 %v655_v58, %v3237_v54 }
 0x148   :  { %v657_v63 = vpop.f32.mrf.mxu0 }
 0x149   :  { %v893_v2 = vmax.f32 %v820_v61, %v821_v62  ;;  %v658_v11 = vadd.f32 %v657_v63, %v3233_v52  ;;  %v822_v26 = vmax.f32 %v656_v15, 0.0 }
 0x14a   :  { %v659_v4 = vpop.f32.mrf.mxu0 }
 0x14b   :  { %v929_v6 = vmax.f32 %v891_v1, %v893_v2  ;;  %v660_v17 = vadd.f32 %v659_v4, %v3237_v54  ;;  %v823_v21 = vmax.f32 %v658_v11, 0.0 }
 0x14c   :  { %v661_v7 = vpop.f32.mrf.mxu0 }
 0x14d   :  { %v3343_v8 = vpack.c.bf16 %v929_v6, %v928_v5  ;;  %v662_v12 = vadd.f32 %v661_v7, %v3233_v52  ;;  %v824_v28 = vmax.f32 %v660_v17, 0.0  ;;  %v894_v33 = vmax.f32 %v822_v26, %v823_v21 }
 0x14e   :  { %v665_v9 = vpop.f32.mrf.mxu0 }
 0x14f   :  { %1326 = vmatprep.mubr.bf16.mxu1 %v3343_v8  ;;  %v666_v13 = vadd.f32 %v665_v9, %v3237_v54  ;;  %v825_v22 = vmax.f32 %v662_v12, 0.0 }
 0x150   :  { %v667_v10 = vpop.f32.mrf.mxu0  ;;  %1327 = vmatmul.mubr.bf16.gmra.mxu1 %v3331_v35 }
 0x151   :  { %v668_v14 = vadd.f32 %v667_v10, %v3233_v52  ;;  %v826_v23 = vmax.f32 %v666_v13, 0.0  ;;  %v895_v34 = vmax.f32 %v824_v28, %v825_v22 }
 0x152   :  { %v669_v16 = vpop.f32.mrf.mxu0 }
 0x153   :  { %v827_v18 = vmax.f32 %v668_v14, 0.0  ;;  %v670_v19 = vadd.f32 %v669_v16, %v3237_v54 }
 0x154   :  { %v671_v20 = vpop.f32.mrf.mxu0 }
 0x155   :  { %v672_v25 = vadd.f32 %v671_v20, %v3233_v52  ;;  %v896_v29 = vmax.f32 %v826_v23, %v827_v18  ;;  %v828_v30 = vmax.f32 %v670_v19, 0.0 }
 0x156   :  { %v675_v27 = vpop.f32.mrf.mxu0 }
 0x157   :  { %v829_v31 = vmax.f32 %v672_v25, 0.0  ;;  %v930_v38 = vmax.f32 %v894_v33, %v896_v29  ;;  %v676_v51 = vadd.f32 %v675_v27, %v3237_v54 }
 0x158   :  { %v677_v32 = vpop.f32.mrf.mxu0 }
 0x159   :  { %v897_v36 = vmax.f32 %v828_v30, %v829_v31  ;;  %v678_v44 = vadd.f32 %v677_v32, %v3233_v52  ;;  %v830_v63 = vmax.f32 %v676_v51, 0.0 }
 0x15a   :  { %v679_v37 = vpop.f32.mrf.mxu0 }
 0x15b   :  { %v931_v39 = vmax.f32 %v895_v34, %v897_v36  ;;  %v680_v55 = vadd.f32 %v679_v37, %v3237_v54  ;;  %v831_v59 = vmax.f32 %v678_v44, 0.0 }
 0x15c   :  { %v681_v40 = vpop.f32.mrf.mxu0 }
 0x15d   :  { %v3355_v41 = vpack.c.bf16 %v931_v39, %v930_v38  ;;  %v682_v46 = vadd.f32 %v681_v40, %v3233_v52  ;;  %v832_v1 = vmax.f32 %v680_v55, 0.0  ;;  %v898_v7 = vmax.f32 %v830_v63, %v831_v59 }
 0x15e   :  { %v685_v42 = vpop.f32.mrf.mxu0 }
 0x15f   :  { %1336 = vmatprep.mubr.bf16.mxu1 %v3355_v41  ;;  %v686_v48 = vadd.f32 %v685_v42, %v3237_v54  ;;  %v833_v60 = vmax.f32 %v682_v46, 0.0  ;;  %v2784_v42 = vld [vmem:[%s3822_s5 + $0xf8] sm:$0xff]  }
 0x160   :  { %v687_v43 = vpop.f32.mrf.mxu0  ;;  %1337 = vmatmul.mubr.bf16.gmra.mxu1 %v3343_v8  ;;  %2501 = vmatprep.subr.bf16.mxu0 %v2784_v42 }
 0x161   :  { %v688_v50 = vadd.f32 %v687_v43, %v3233_v52  ;;  %v834_v61 = vmax.f32 %v686_v48, 0.0  ;;  %v899_v9 = vmax.f32 %v832_v1, %v833_v60  ;;  %v2785_v48 = vld [vmem:[%s3822_s5 + $0xb8] sm:$0xff]  }
 0x162   :  { %v689_v53 = vpop.f32.mrf.mxu0  ;;  %2502 = vmatpush3.bf16.msra.mxu0 %v2785_v48 }
 0x163   :  { %v835_v56 = vmax.f32 %v688_v50, 0.0  ;;  %v690_v57 = vadd.f32 %v689_v53, %v3237_v54 }
 0x164   :  { %v691_v58 = vpop.f32.mrf.mxu0 }
 0x165   :  { %v692_v62 = vadd.f32 %v691_v58, %v3233_v52  ;;  %v900_v2 = vmax.f32 %v834_v61, %v835_v56  ;;  %v836_v4 = vmax.f32 %v690_v57, 0.0 }
 0x166   :  { %v695_v0 = vpop.f32.mrf.mxu0 }
 0x167   :  { %v837_v5 = vmax.f32 %v692_v62, 0.0  ;;  %v932_v12 = vmax.f32 %v898_v7, %v900_v2  ;;  %v696_v22 = vadd.f32 %v695_v0, %v3237_v54 }
 0x168   :  { %v697_v6 = vpop.f32.mrf.mxu0 }
 0x169   :  { %v901_v10 = vmax.f32 %v836_v4, %v837_v5  ;;  %v698_v18 = vadd.f32 %v697_v6, %v3233_v52  ;;  %v838_v33 = vmax.f32 %v696_v22, 0.0 }
 0x16a   :  { %v699_v11 = vpop.f32.mrf.mxu0 }
 0x16b   :  { %v933_v13 = vmax.f32 %v899_v9, %v901_v10  ;;  %v700_v25 = vadd.f32 %v699_v11, %v3237_v54  ;;  %v839_v29 = vmax.f32 %v698_v18, 0.0 }
 0x16c   :  { %v701_v14 = vpop.f32.mrf.mxu0 }
 0x16d   :  { %v3367_v15 = vpack.c.bf16 %v933_v13, %v932_v12  ;;  %v702_v19 = vadd.f32 %v701_v14, %v3233_v52  ;;  %v840_v36 = vmax.f32 %v700_v25, 0.0  ;;  %v902_v43 = vmax.f32 %v838_v33, %v839_v29 }
 0x16e   :  { %v705_v16 = vpop.f32.mrf.mxu0 }
 0x16f   :  { %1346 = vmatprep.mubr.bf16.mxu1 %v3367_v15  ;;  %v706_v20 = vadd.f32 %v705_v16, %v3237_v54  ;;  %v841_v30 = vmax.f32 %v702_v19, 0.0 }
 0x170   :  { %v707_v17 = vpop.f32.mrf.mxu0  ;;  %1347 = vmatmul.mubr.bf16.gmra.mxu1 %v3355_v41 }
 0x171   :  { %v708_v21 = vadd.f32 %v707_v17, %v3233_v52  ;;  %v842_v31 = vmax.f32 %v706_v20, 0.0  ;;  %v903_v44 = vmax.f32 %v840_v36, %v841_v30 }
 0x172   :  { %v709_v23 = vpop.f32.mrf.mxu0 }
 0x173   :  { %v843_v26 = vmax.f32 %v708_v21, 0.0  ;;  %v710_v27 = vadd.f32 %v709_v23, %v3237_v54 }
 0x174   :  { %v711_v28 = vpop.f32.mrf.mxu0 }
 0x175   :  { %v712_v32 = vadd.f32 %v711_v28, %v3233_v52  ;;  %v904_v37 = vmax.f32 %v842_v31, %v843_v26  ;;  %v844_v38 = vmax.f32 %v710_v27, 0.0 }
 0x176   :  { %v715_v34 = vpop.f32.mrf.mxu0 }
 0x177   :  { %v845_v39 = vmax.f32 %v712_v32, 0.0  ;;  %v934_v51 = vmax.f32 %v902_v43, %v904_v37  ;;  %v716_v55 = vadd.f32 %v715_v34, %v3237_v54 }
 0x178   :  { %v717_v40 = vpop.f32.mrf.mxu0 }
 0x179   :  { %v905_v46 = vmax.f32 %v844_v38, %v845_v39  ;;  %v718_v57 = vadd.f32 %v717_v40, %v3233_v52  ;;  %v846_v60 = vmax.f32 %v716_v55, 0.0 }
 0x17a   :  { %v719_v50 = vpop.f32.mrf.mxu0 }
 0x17b   :  { %v935_v53 = vmax.f32 %v903_v44, %v905_v46  ;;  %v720_v61 = vadd.f32 %v719_v50, %v3237_v54  ;;  %v847_v63 = vmax.f32 %v718_v57, 0.0  ;;  %v2786_v44 = vld [vmem:[%s3822_s5 + $0xf0] sm:$0xff]  }
 0x17c   :  { %v721_v56 = vpop.f32.mrf.mxu0  ;;  %v2787_v46 = vld [vmem:[%s3822_s5 + $0xb0] sm:$0xff]   ;;  %2503 = vmatprep.subr.bf16.mxu0 %v2786_v44 }
 0x17d   :  { %v3387_v58 = vpack.c.bf16 %v935_v53, %v934_v51  ;;  %v722_v0 = vadd.f32 %v721_v56, %v3233_v52  ;;  %v848_v5 = vmax.f32 %v720_v61, 0.0  ;;  %v906_v19 = vmax.f32 %v846_v60, %v847_v63  ;;  %2504 = vmatpush3.bf16.msra.mxu0 %v2787_v46 }
 0x17e   :  { %v725_v59 = vpop.f32.mrf.mxu0 }
 0x17f   :  { %1356 = vmatprep.mubr.bf16.mxu1 %v3387_v58  ;;  %v726_v1 = vadd.f32 %v725_v59, %v3237_v54  ;;  %v849_v10 = vmax.f32 %v722_v0, 0.0 }
 0x180   :  { %v727_v62 = vpop.f32.mrf.mxu0  ;;  %1357 = vmatmul.mubr.bf16.gmra.mxu1 %v3367_v15 }
 0x181   :  { %v728_v2 = vadd.f32 %v727_v62, %v3233_v52  ;;  %v850_v11 = vmax.f32 %v726_v1, 0.0  ;;  %v907_v20 = vmax.f32 %v848_v5, %v849_v10  ;;  %v2840_v1 = vmov 0  }
 0x182   :  { %v729_v4 = vpop.f32.mrf.mxu0 }
 0x183   :  { %v851_v6 = vmax.f32 %v728_v2, 0.0  ;;  %v730_v7 = vadd.f32 %v729_v4, %v3237_v54  ;;  %v2788_v2 = vld [vmem:[%s3822_s5 + $0xe8] sm:$0xff]  }
 0x184   :  { %v731_v9 = vpop.f32.mrf.mxu0  ;;  %v2789_v4 = vld [vmem:[%s3822_s5 + $0xa8] sm:$0xff]   ;;  %2505 = vmatprep.subr.bf16.mxu0 %v2788_v2 }
 0x185   :  { %v732_v12 = vadd.f32 %v731_v9, %v3233_v52  ;;  %v908_v14 = vmax.f32 %v850_v11, %v851_v6  ;;  %v852_v16 = vmax.f32 %v730_v7, 0.0  ;;  %2506 = vmatpush3.bf16.msra.mxu0 %v2789_v4  ;;  %v2792_v9 = vld [vmem:[%s3822_s5 + $0x78] sm:$0xff]   ;;  %v2808_v4 = vld [vmem:[%s3822_s5 + $0x48] sm:$0xff]  }
 0x186   :  { %v735_v13 = vpop.f32.mrf.mxu0  ;;  %2479 = vmatprep.subr.bf16.mxu1 %v2792_v9  ;;  %v2793_v11 = vld [vmem:[%s3822_s5 + $0x38] sm:$0xff]  }
 0x187   :  { %v853_v17 = vmax.f32 %v732_v12, 0.0  ;;  %v936_v23 = vmax.f32 %v906_v19, %v908_v14  ;;  %v736_v26 = vadd.f32 %v735_v13, %v3237_v54  ;;  %v2794_v12 = vld [vmem:[%s3822_s5 + $0xd8] sm:$0xff]   ;;  %v2797_v14 = vld [vmem:[%s3822_s5 + $0x30] sm:$0xff]  }
 0x188   :  { %v737_v18 = vpop.f32.mrf.mxu0  ;;  %v2796_v13 = vld [vmem:[%s3822_s5 + $0x98] sm:$0xff]  }
 0x189   :  { %v909_v21 = vmax.f32 %v852_v16, %v853_v17  ;;  %v738_v28 = vadd.f32 %v737_v18, %v3233_v52  ;;  %v854_v31 = vmax.f32 %v736_v26, 0.0 }
 0x18a   :  { %v739_v22 = vpop.f32.mrf.mxu0 }
 0x18b   :  { %v937_v25 = vmax.f32 %v907_v20, %v909_v21  ;;  %v740_v32 = vadd.f32 %v739_v22, %v3237_v54  ;;  %v855_v34 = vmax.f32 %v738_v28, 0.0 }
 0x18c   :  { %v741_v27 = vpop.f32.mrf.mxu0 }
 0x18d   :  { %v3399_v29 = vpack.c.bf16 %v937_v25, %v936_v23  ;;  %v742_v36 = vadd.f32 %v741_v27, %v3233_v52  ;;  %v856_v40 = vmax.f32 %v740_v32, 0.0  ;;  %v910_v59 = vmax.f32 %v854_v31, %v855_v34 }
 0x18e   :  { %v745_v30 = vpop.f32.mrf.mxu0 }
 0x18f   :  { %1366 = vmatprep.mubr.bf16.mxu1 %v3399_v29  ;;  %v746_v37 = vadd.f32 %v745_v30, %v3237_v54  ;;  %v857_v50 = vmax.f32 %v742_v36, 0.0 }
 0x190   :  { %v747_v33 = vpop.f32.mrf.mxu0  ;;  %1367 = vmatmul.mubr.bf16.gmra.mxu1 %v3387_v58 }
 0x191   :  { %v748_v38 = vadd.f32 %v747_v33, %v3233_v52  ;;  %v858_v51 = vmax.f32 %v746_v37, 0.0  ;;  %v911_v60 = vmax.f32 %v856_v40, %v857_v50  ;;  %v2800_v50 = vld [vmem:[%s3822_s5 + $0x60] sm:$0xff]  }
 0x192   :  { %v749_v39 = vpop.f32.mrf.mxu0 }
 0x193   :  { %v859_v42 = vmax.f32 %v748_v38, 0.0  ;;  %v750_v43 = vadd.f32 %v749_v39, %v3237_v54  ;;  %v2799_v39 = vld [vmem:[%s3822_s5 + $0x28] sm:$0xff]  }
 0x194   :  { %v751_v48 = vpop.f32.mrf.mxu0 }
 0x195   :  { %v752_v53 = vadd.f32 %v751_v48, %v3233_v52  ;;  %v912_v55 = vmax.f32 %v858_v51, %v859_v42  ;;  %v860_v56 = vmax.f32 %v750_v43, 0.0  ;;  %v2801_v51 = vld [vmem:[%s3822_s5 + $0x20] sm:$0xff]  }
 0x196   :  { %v755_v5 = vpop.f32.mrf.mxu0 }
 0x197   :  { %v861_v57 = vmax.f32 %v752_v53, 0.0  ;;  %v938_v62 = vmax.f32 %v910_v59, %v912_v55  ;;  %v756_v17 = vadd.f32 %v755_v5, %v3237_v54  ;;  %v2810_v5 = vld [vmem:[%s3822_s5 + $0x8] sm:$0xff]  }
 0x198   :  { %v757_v6 = vpop.f32.mrf.mxu0 }
 0x199   :  { %v913_v61 = vmax.f32 %v860_v56, %v861_v57  ;;  %v758_v18 = vadd.f32 %v757_v6, %v3233_v52  ;;  %v862_v25 = vmax.f32 %v756_v17, 0.0  ;;  %v2802_v56 = vld [vmem:[%s3822_s5 + $0xd0] sm:$0xff]   ;;  %v2814_v17 = vld [vmem:[%s3822_s5 + $0xc0] sm:$0xff]  }
 0x19a   :  { %v759_v7 = vpop.f32.mrf.mxu0  ;;  %v2803_v57 = vld [vmem:[%s3822_s5 + $0x90] sm:$0xff]  }
 0x19b   :  { %v939_v63 = vmax.f32 %v911_v60, %v913_v61  ;;  %v760_v19 = vadd.f32 %v759_v7, %v3237_v54  ;;  %v863_v26 = vmax.f32 %v758_v18, 0.0  ;;  %v2804_v61 = vld [vmem:[%s3822_s5 + $0x58] sm:$0xff]   ;;  %v2813_v7 = vld [vmem:[%s3822_s5] sm:$0xff]  }
 0x19c   :  { %v2816_v18 = vld [vmem:[%s3822_s5 + $0x80] sm:$0xff]  }
 0x19d   :  { %v3415_v0 = vpack.c.bf16 %v939_v63, %v938_v62  ;;  %v864_v27 = vmax.f32 %v760_v19, 0.0  ;;  %v914_v36 = vmax.f32 %v862_v25, %v863_v26  ;;  %v2805_v62 = vld [vmem:[%s3822_s5 + $0x18] sm:$0xff]  }
 0x19f   :  { %1376 = vmatprep.mubr.bf16.mxu1 %v3415_v0 }
 0x1a0   :  { %1377 = vmatmul.mubr.bf16.gmra.mxu1 %v3399_v29 }
 0x1a1   :  { %1419 = vmatprep.mubr.bf16.mxu1 %v2840_v1 }
 0x1a8   :  { %1420 = vmatmul.mubr.bf16.vlgmr.msra.gmra.mxu1 %v3287_v24  ;;  %v2790_v24 = vld [vmem:[%s3822_s5 + $0xe0] sm:$0xff]  }
 0x1a9   :  { %1429 = vmatprep.mubr.bf16.mxu1 %v2840_v1  ;;  %2507 = vmatprep.subr.bf16.mxu0 %v2790_v24 }
 0x1aa   :  { %2480 = vmatpush3.bf16.msra.mxu1 %v2793_v11 }
 0x1b0   :  { %1430 = vmatmul.mubr.bf16.gmra.mxu1 %v3319_v3  ;;  %v2791_v3 = vld [vmem:[%s3822_s5 + $0xa0] sm:$0xff]  }
 0x1b1   :  { %1439 = vmatprep.mubr.bf16.mxu1 %v2840_v1  ;;  %2508 = vmatpush3.bf16.msra.mxu0 %v2791_v3  ;;  %v2812_v3 = vld [vmem:[%s3822_s5 + $0x40] sm:$0xff]  }
 0x1b2   :  { %2509 = vmatprep.subr.bf16.mxu0 %v2794_v12 }
 0x1b5   :  { %2510 = vmatpush3.bf16.msra.mxu0 %v2796_v13 }
 0x1b6   :  { %2511 = vmatprep.subr.bf16.mxu0 %v2802_v56 }
 0x1b8   :  { %1440 = vmatmul.mubr.bf16.gmra.mxu1 %v3331_v35  ;;  %v761_v35 = vpop.f32.mrf.mxu0 }
 0x1b9   :  { %1449 = vmatprep.mubr.bf16.mxu1 %v2840_v1  ;;  %v762_v20 = vadd.f32 %v761_v35, %v3233_v52  ;;  %2512 = vmatpush3.bf16.msra.mxu0 %v2803_v57  ;;  %v2809_v35 = vld [vmem:[%s3822_s5 + $0xc8] sm:$0xff]  }
 0x1ba   :  { %2513 = vmatprep.subr.bf16.mxu0 %v2809_v35 }
 0x1bb   :  { %v865_v28 = vmax.f32 %v762_v20, 0.0 }
 0x1c0   :  { %1450 = vmatmul.mubr.bf16.gmra.mxu1 %v3343_v8  ;;  %v765_v8 = vpop.f32.mrf.mxu0 }
 0x1c1   :  { %1459 = vmatprep.mubr.bf16.mxu1 %v2840_v1 }
 0x1c2   :  { %v767_v10 = vpop.f32.mrf.mxu0 }
 0x1c3   :  { %v768_v21 = vadd.f32 %v767_v10, %v3233_v52 }
 0x1c5   :  { %v867_v32 = vmax.f32 %v768_v21, 0.0 }
 0x1c8   :  { %1460 = vmatmul.mubr.bf16.gmra.mxu1 %v3355_v41  ;;  %v769_v41 = vpop.f32.mrf.mxu0 }
 0x1c9   :  { %1469 = vmatprep.mubr.bf16.mxu1 %v2840_v1  ;;  %v770_v22 = vadd.f32 %v769_v41, %v3237_v54 }
 0x1ca   :  { %v771_v16 = vpop.f32.mrf.mxu0 }
 0x1cb   :  { %v772_v23 = vadd.f32 %v771_v16, %v3233_v52  ;;  %v868_v33 = vmax.f32 %v770_v22, 0.0  ;;  %v915_v52 = vmax.f32 %v864_v27, %v865_v28 }
 0x1cd   :  { %v869_v34 = vmax.f32 %v772_v23, 0.0 }
 0x1cf   :  { %v917_v38 = vmax.f32 %v868_v33, %v869_v34 }
 0x1d0   :  { %1470 = vmatmul.mubr.bf16.gmra.mxu1 %v3367_v15  ;;  %v2795_v15 = vld [vmem:[%s3822_s5 + $0x70] sm:$0xff]   ;;  %v3474_v30 = vpop.f32.mrf.mxu1 }
 0x1d1   :  { %1479 = vmatprep.mubr.bf16.mxu1 %v2840_v1  ;;  %2481 = vmatprep.subr.bf16.mxu1 %v2795_v15  ;;  %v941_v43 = vmax.f32 %v915_v52, %v917_v38  ;;  %v2841_v15 = vmov 0.0  }
 0x1d2   :  { %2482 = vmatpush3.bf16.msra.mxu1 %v2797_v14  ;;  %v3479_v37 = vpop.f32.mrf.mxu1 }
 0x1d4   :  { %v3486_v42 = vpop.f32.mrf.mxu1 }
 0x1d6   :  { %v3488_v44 = vpop.f32.mrf.mxu1 }
 0x1d8   :  { %1480 = vmatmul.mubr.bf16.gmra.mxu1 %v3387_v58  ;;  %v766_v58 = vadd.f32 %v765_v8, %v3237_v54  ;;  %v2798_v54 = vld [vmem:[%s3822_s5 + $0x68] sm:$0xff]  }
 0x1d9   :  { %1489 = vmatprep.mubr.bf16.mxu1 %v2840_v1  ;;  %2483 = vmatprep.subr.bf16.mxu1 %v2798_v54  ;;  %v2811_v8 = vld [vmem:[%s3822_s5 + $0x88] sm:$0xff]  }
 0x1da   :  { %v866_v31 = vmax.f32 %v766_v58, 0.0  ;;  %2484 = vmatpush3.bf16.msra.mxu1 %v2799_v39  ;;  %2514 = vmatpush3.bf16.msra.mxu0 %v2811_v8 }
 0x1db   :  { %2485 = vmatprep.subr.bf16.mxu1 %v2800_v50  ;;  %2515 = vmatprep.subr.bf16.mxu0 %v2814_v17 }
 0x1de   :  { %2486 = vmatpush3.bf16.msra.mxu1 %v2801_v51  ;;  %2516 = vmatpush3.bf16.msra.mxu0 %v2816_v18 }
 0x1df   :  { %2487 = vmatprep.subr.bf16.mxu1 %v2804_v61  ;;  %2570 = vmatprep.subr.bf16.mxu0 %v2841_v15 }
 0x1e0   :  { %1490 = vmatmul.mubr.bf16.gmra.mxu1 %v3399_v29  ;;  %v916_v29 = vmax.f32 %v866_v31, %v867_v32  ;;  %v3490_v48 = vpop.f32.mrf.mxu1 }
 0x1e1   :  { %1499 = vmatprep.mubr.bf16.mxu1 %v2840_v1 }
 0x1e2   :  { %v940_v40 = vmax.f32 %v914_v36, %v916_v29  ;;  %v3498_v53 = vpop.f32.mrf.mxu1  ;;  %2488 = vmatpush3.bf16.msra.mxu1 %v2805_v62  ;;  %v1002_v36 = vld [vmem:[%s3823_s4] sm:$0x3] }
 0x1e3   :  { %v3613_v38 = vrot.slane %v1002_v36, %v109_v49 }
 0x1e4   :  { %v953_v46 = vpack.c.bf16 %v941_v43, %v940_v40  ;;  %v3500_v55 = vpop.f32.mrf.mxu1  ;;  %v3619_v40 = vrot.slane %v1002_v36, %v113_v47 }
 0x1e5   :  { %v1293_v49 = vadd.f32 %v3486_v42, %v3613_v38 }
 0x1e6   :  { %v3508_v59 = vpop.f32.mrf.mxu1  ;;  %v1291_v51 = vadd.f32 %v3479_v37, %v3619_v40  ;;  %v1295_v45 = vadd.f32 %v3488_v44, %v3619_v40  ;;  %v1303_v44 = vadd.f32 %v3500_v55, %v3613_v38 }
 0x1e8   :  { %1500 = vmatmul.mubr.bf16.gmra.mxu1 %v3415_v0  ;;  %v2806_v0 = vld [vmem:[%s3822_s5 + $0x50] sm:$0xff]  }
 0x1e9   :  { %1509 = vmatprep.mubr.bf16.mxu1 %v2840_v1  ;;  %v2807_v1 = vld [vmem:[%s3822_s5 + $0x10] sm:$0xff]   ;;  %2489 = vmatprep.subr.bf16.mxu1 %v2806_v0 }
 0x1ea   :  { %2490 = vmatpush3.bf16.msra.mxu1 %v2807_v1 }
 0x1eb   :  { %2491 = vmatprep.subr.bf16.mxu1 %v2808_v4 }
 0x1ee   :  { %2492 = vmatpush3.bf16.msra.mxu1 %v2810_v5 }
 0x1ef   :  { %2493 = vmatprep.subr.bf16.mxu1 %v2812_v3 }
 0x1f0   :  { %1510 = vmatmul.mubr.bf16.gmra.mxu1 %v953_v46  ;;  %v3510_v60 = vpop.f32.mrf.mxu1  ;;  %v1289_v46 = vadd.f32 %v3474_v30, %v3613_v38  ;;  %v1299_v30 = vadd.f32 %v3490_v48, %v3613_v38 }
 0x1f2   :  { %v3518_v63 = vpop.f32.mrf.mxu1  ;;  %2494 = vmatpush3.bf16.msra.mxu1 %v2813_v7  ;;  %v1301_v7 = vadd.f32 %v3498_v53, %v3619_v40  ;;  %v1309_v53 = vadd.f32 %v3510_v60, %v3613_v38 }
 0x1f3   :  { %2550 = vmatprep.subr.bf16.mxu1 %v2841_v15 }
 0x1f4   :  { %v3526_v2 = vpop.f32.mrf.mxu1 }
 0x1f6   :  { %v3534_v6 = vpop.f32.mrf.mxu1 }
 0x200   :  { %v3536_v24 = vpop.f32.mrf.mxu1 }
 0x202   :  { %v3550_v9 = vpop.f32.mrf.mxu1 }
 0x204   :  { %v3552_v10 = vpop.f32.mrf.mxu1 }
 0x206   :  { %v3554_v11 = vpop.f32.mrf.mxu1 }
 0x210   :  { %v3556_v41 = vpop.f32.mrf.mxu1 }
 0x212   :  { %v3558_v12 = vpop.f32.mrf.mxu1 }
 0x214   :  { %v3561_v13 = vpop.f32.mrf.mxu1 }
 0x216   :  { %v3563_v14 = vpop.f32.mrf.mxu1 }
 0x220   :  { %v3565_v16 = vpop.f32.mrf.mxu1 }
 0x222   :  { %v3573_v19 = vpop.f32.mrf.mxu1 }
 0x224   :  { %v3576_v20 = vpop.f32.mrf.mxu1 }
 0x226   :  { %v3578_v58 = vpop.f32.mrf.mxu1 }
 0x230   :  { %v3580_v21 = vpop.f32.mrf.mxu1 }
 0x232   :  { %v3582_v22 = vpop.f32.mrf.mxu1 }
 0x234   :  { %v3584_v23 = vpop.f32.mrf.mxu1 }
 0x236   :  { %v3586_v25 = vpop.f32.mrf.mxu1 }
 0x240   :  { %v3588_v26 = vpop.f32.mrf.mxu1 }
 0x242   :  { %v3590_v27 = vpop.f32.mrf.mxu1 }
 0x244   :  { %v3592_v28 = vpop.f32.mrf.mxu1 }
 0x246   :  { %v3594_v31 = vpop.f32.mrf.mxu1 }
 0x250   :  { %v3596_v32 = vpop.f32.mrf.mxu1 }
 0x252   :  { %v3598_v33 = vpop.f32.mrf.mxu1 }
 0x254   :  { %v3600_v34 = vpop.f32.mrf.mxu1 }
 0x256   :  { %v3602_v54 = vpop.f32.mrf.mxu1 }
 0x260   :  { %v3607_v52 = vpop.f32.mrf.mxu1 }
 0x262   :  { %v3609_v29 = vpop.f32.mrf.mxu1 }
 0x264   :  { %v3615_v39 = vpop.f32.mrf.mxu1 }
 0x266   :  { %v3621_v43 = vpop.f32.mrf.mxu1 }
 0x268   :  { %v1421_v50 = vpop.f32.mrf.mxu1 }
 0x269   :  { %v1422_v56 = vadd.f32 %v1421_v50, %v1289_v46  ;;  %v1305_v50 = vadd.f32 %v3508_v59, %v3619_v40  ;;  %v1313_v59 = vadd.f32 %v3526_v2, %v3613_v38  ;;  %v1321_v2 = vadd.f32 %v3550_v9, %v3619_v40 }
 0x26a   :  { %v1423_v57 = vpop.f32.mrf.mxu1  ;;  %v1329_v9 = vadd.f32 %v3556_v41, %v3613_v38 }
 0x26b   :  { %v1424_v61 = vadd.f32 %v1423_v57, %v1291_v51  ;;  %v1520_v47 = vmax.f32 %v1422_v56, 0.0 }
 0x26c   :  { %v1425_v62 = vpop.f32.mrf.mxu1 }
 0x26d   :  { %v1521_v0 = vmax.f32 %v1424_v61, 0.0  ;;  %v1426_v1 = vadd.f32 %v1425_v62, %v1293_v49  ;;  %v1311_v62 = vadd.f32 %v3518_v63, %v3619_v40 }
 0x26e   :  { %v1427_v4 = vpop.f32.mrf.mxu1 }
 0x26f   :  { %v1560_v5 = vmax.f32 %v1520_v47, %v1521_v0  ;;  %v1428_v3 = vadd.f32 %v1427_v4, %v1295_v45  ;;  %v1522_v35 = vmax.f32 %v1426_v1, 0.0 }
 0x270   :  { %v1431_v37 = vpop.f32.mrf.mxu1 }
 0x271   :  { %v1523_v42 = vmax.f32 %v1428_v3, 0.0  ;;  %v1432_v8 = vadd.f32 %v1431_v37, %v1299_v30  ;;  %v1315_v37 = vadd.f32 %v3534_v6, %v3619_v40 }
 0x272   :  { %v1433_v17 = vpop.f32.mrf.mxu1 }
 0x273   :  { %v1561_v18 = vmax.f32 %v1522_v35, %v1523_v42  ;;  %v1434_v36 = vadd.f32 %v1433_v17, %v1301_v7  ;;  %v1524_v48 = vmax.f32 %v1432_v8, 0.0 }
 0x274   :  { %v1435_v46 = vpop.f32.mrf.mxu1 }
 0x275   :  { %v1525_v51 = vmax.f32 %v1434_v36, 0.0  ;;  %v1436_v56 = vadd.f32 %v1435_v46, %v1303_v44 }
 0x276   :  { %v1437_v57 = vpop.f32.mrf.mxu1 }
 0x277   :  { %v1562_v49 = vmax.f32 %v1524_v48, %v1525_v51  ;;  %v1438_v61 = vadd.f32 %v1437_v57, %v1305_v50  ;;  %v1526_v47 = vmax.f32 %v1436_v56, 0.0 }
 0x278   :  { %v1441_v45 = vpop.f32.mrf.mxu1 }
 0x279   :  { %v1580_v55 = vmax.f32 %v1560_v5, %v1562_v49  ;;  %v1527_v0 = vmax.f32 %v1438_v61, 0.0  ;;  %v1442_v1 = vadd.f32 %v1441_v45, %v1309_v53  ;;  %v1319_v5 = vadd.f32 %v3536_v24, %v3613_v38 }
 0x27a   :  { %v1443_v4 = vpop.f32.mrf.mxu1  ;;  %v1325_v24 = vadd.f32 %v3554_v11, %v3619_v40  ;;  %v1333_v11 = vadd.f32 %v3561_v13, %v3613_v38  ;;  %v2815_v13 = vld [vmem:[%s3822_s5 + $0x138] sm:$0xff]  }
 0x27b   :  { %v1563_v30 = vmax.f32 %v1526_v47, %v1527_v0  ;;  %v1444_v3 = vadd.f32 %v1443_v4, %v1311_v62  ;;  %v1528_v35 = vmax.f32 %v1442_v1, 0.0  ;;  %v1331_v0 = vadd.f32 %v3558_v12, %v3619_v40 }
 0x27c   :  { %v1445_v60 = vpop.f32.mrf.mxu1 }
 0x27d   :  { %v1581_v7 = vmax.f32 %v1561_v18, %v1563_v30  ;;  %v1529_v42 = vmax.f32 %v1444_v3, 0.0  ;;  %v1446_v8 = vadd.f32 %v1445_v60, %v1313_v59  ;;  %v1323_v18 = vadd.f32 %v3552_v10, %v3613_v38 }
 0x27e   :  { %v1447_v63 = vpop.f32.mrf.mxu1 }
 0x27f   :  { %v1590_v17 = vpack.c.bf16 %v1581_v7, %v1580_v55  ;;  %v1564_v44 = vmax.f32 %v1528_v35, %v1529_v42  ;;  %v1448_v36 = vadd.f32 %v1447_v63, %v1315_v37  ;;  %v1530_v50 = vmax.f32 %v1446_v8, 0.0 }
 0x280   :  { %v1451_v46 = vpop.f32.mrf.mxu1  ;;  %v1335_v7 = vadd.f32 %v3563_v14, %v3619_v40  ;;  %v1341_v14 = vadd.f32 %v3573_v19, %v3619_v40 }
 0x281   :  { %v1531_v48 = vmax.f32 %v1448_v36, 0.0  ;;  %v1452_v51 = vadd.f32 %v1451_v46, %v1319_v5  ;;  %v1339_v5 = vadd.f32 %v3565_v16, %v3613_v38  ;;  %v1343_v16 = vadd.f32 %v3576_v20, %v3613_v38 }
 0x282   :  { %v1453_v6 = vpop.f32.mrf.mxu1 }
 0x283   :  { %v1565_v56 = vmax.f32 %v1530_v50, %v1531_v48  ;;  %v1454_v57 = vadd.f32 %v1453_v6, %v1321_v2  ;;  %v1532_v49 = vmax.f32 %v1452_v51, 0.0 }
 0x284   :  { %v1455_v53 = vpop.f32.mrf.mxu1 }
 0x285   :  { %v1533_v61 = vmax.f32 %v1454_v57, 0.0  ;;  %v1456_v62 = vadd.f32 %v1455_v53, %v1323_v18  ;;  %v2817_v57 = vld [vmem:[%s3822_s5 + $0x130] sm:$0xff]  }
 0x286   :  { %v1457_v45 = vpop.f32.mrf.mxu1 }
 0x287   :  { %v1566_v55 = vmax.f32 %v1532_v49, %v1533_v61  ;;  %v1458_v47 = vadd.f32 %v1457_v45, %v1325_v24  ;;  %v1534_v4 = vmax.f32 %v1456_v62, 0.0  ;;  %v1349_v61 = vadd.f32 %v3580_v21, %v3613_v38 }
 0x288   :  { %v1461_v1 = vpop.f32.mrf.mxu1  ;;  %v1353_v21 = vadd.f32 %v3584_v23, %v3613_v38  ;;  %v1359_v23 = vadd.f32 %v3588_v26, %v3613_v38  ;;  %v1363_v26 = vadd.f32 %v3592_v28, %v3613_v38  ;;  %v1369_v28 = vadd.f32 %v3596_v32, %v3613_v38 }
 0x289   :  { %v1582_v10 = vmax.f32 %v1564_v44, %v1566_v55  ;;  %v1535_v59 = vmax.f32 %v1458_v47, 0.0  ;;  %v1462_v30 = vadd.f32 %v1461_v1, %v1329_v9  ;;  %v2818_v9 = vld [vmem:[%s3822_s5 + $0x128] sm:$0xff]   ;;  %v1351_v55 = vadd.f32 %v3582_v22, %v3619_v40 }
 0x28a   :  { %v1463_v3 = vpop.f32.mrf.mxu1  ;;  %v1355_v22 = vadd.f32 %v3586_v25, %v3619_v40  ;;  %v1373_v32 = vadd.f32 %v3600_v34, %v3613_v38  ;;  %v1379_v34 = vadd.f32 %v3607_v52, %v3613_v38 }
 0x28b   :  { %v1567_v37 = vmax.f32 %v1534_v4, %v1535_v59  ;;  %v1464_v60 = vadd.f32 %v1463_v3, %v1331_v0  ;;  %v1536_v42 = vmax.f32 %v1462_v30, 0.0  ;;  %v2819_v3 = vld [vmem:[%s3822_s5 + $0x120] sm:$0xff]  }
 0x28c   :  { %v1465_v41 = vpop.f32.mrf.mxu1 }
 0x28d   :  { %v1583_v35 = vmax.f32 %v1565_v56, %v1567_v37  ;;  %v1537_v8 = vmax.f32 %v1464_v60, 0.0  ;;  %v1466_v63 = vadd.f32 %v1465_v41, %v1333_v11 }
 0x28e   :  { %v1467_v12 = vpop.f32.mrf.mxu1 }
 0x28f   :  { %v1568_v44 = vmax.f32 %v1536_v42, %v1537_v8  ;;  %v1468_v36 = vadd.f32 %v1467_v12, %v1335_v7  ;;  %v1591_v46 = vpack.c.bf16 %v1583_v35, %v1582_v10  ;;  %v1538_v50 = vmax.f32 %v1466_v63, 0.0  ;;  %v2820_v12 = vld [vmem:[%s3822_s5 + $0x118] sm:$0xff]  }
 0x290   :  { %v1471_v2 = vpop.f32.mrf.mxu1 }
 0x291   :  { %v1539_v48 = vmax.f32 %v1468_v36, 0.0  ;;  %v1472_v51 = vadd.f32 %v1471_v2, %v1339_v5  ;;  %1954 = vmatprep.mubr.bf16.mxu1 %v1591_v46  ;;  %v1361_v5 = vadd.f32 %v3590_v27, %v3619_v40  ;;  %v1365_v27 = vadd.f32 %v3594_v31, %v3619_v40 }
 0x292   :  { %v1473_v6 = vpop.f32.mrf.mxu1  ;;  %1955 = vmatmul.mubr.bf16.vlgmr.msra.gmra.mxu1 %v1590_v17  ;;  %v1345_v17 = vadd.f32 %v3578_v58, %v3619_v40 }
 0x293   :  { %v1569_v18 = vmax.f32 %v1538_v50, %v1539_v48  ;;  %v1474_v56 = vadd.f32 %v1473_v6, %v1341_v14  ;;  %2551 = vmatpush3.bf16.msra.mxu1 %v2815_v13  ;;  %2566 = vmatprep.mubr.msk.bf16.mxu1 %vm2842_vm2, %v2841_v15  ;;  %v1540_v53 = vmax.f32 %v1472_v51, 0.0  ;;  %v2821_v50 = vld [vmem:[%s3822_s5 + $0x110] sm:$0xff]  }
 0x294   :  { %v1475_v19 = vpop.f32.mrf.mxu1  ;;  %2552 = vmatprep.subr.bf16.mxu1 %v2841_v15 }
 0x295   :  { %v1541_v24 = vmax.f32 %v1474_v56, 0.0  ;;  %v1476_v20 = vadd.f32 %v1475_v19, %v1343_v16  ;;  %v2822_v19 = vld [vmem:[%s3822_s5 + $0x108] sm:$0xff]  }
 0x296   :  { %v1477_v49 = vpop.f32.mrf.mxu1 }
 0x297   :  { %v1570_v62 = vmax.f32 %v1540_v53, %v1541_v24  ;;  %v1478_v45 = vadd.f32 %v1477_v49, %v1345_v17  ;;  %2553 = vmatpush3.bf16.msra.mxu1 %v2817_v57  ;;  %v1542_v0 = vmax.f32 %v1476_v20, 0.0  ;;  %v1371_v17 = vadd.f32 %v3598_v33, %v3619_v40 }
 0x298   :  { %v1481_v47 = vpop.f32.mrf.mxu1  ;;  %2554 = vmatprep.subr.bf16.mxu1 %v2841_v15  ;;  %v1375_v33 = vadd.f32 %v3602_v54, %v3619_v40  ;;  %v1381_v54 = vadd.f32 %v3609_v29, %v3619_v40 }
 0x299   :  { %v1584_v58 = vmax.f32 %v1568_v44, %v1570_v62  ;;  %v1543_v1 = vmax.f32 %v1478_v45, 0.0  ;;  %v1482_v10 = vadd.f32 %v1481_v47, %v1349_v61 }
 0x29a   :  { %v1483_v4 = vpop.f32.mrf.mxu1 }
 0x29b   :  { %v1571_v59 = vmax.f32 %v1542_v0, %v1543_v1  ;;  %v1484_v30 = vadd.f32 %v1483_v4, %v1351_v55  ;;  %2555 = vmatpush3.bf16.msra.mxu1 %v2818_v9  ;;  %v1544_v60 = vmax.f32 %v1482_v10, 0.0  ;;  %v2823_v9 = vld [vmem:[%s3822_s5 + $0x100] sm:$0xff]  }
 0x29c   :  { %v1485_v11 = vpop.f32.mrf.mxu1  ;;  %2556 = vmatprep.subr.bf16.mxu1 %v2841_v15 }
 0x29d   :  { %v1585_v37 = vmax.f32 %v1569_v18, %v1571_v59  ;;  %v1545_v7 = vmax.f32 %v1484_v30, 0.0  ;;  %v1486_v41 = vadd.f32 %v1485_v11, %v1353_v21 }
 0x29e   :  { %v1487_v35 = vpop.f32.mrf.mxu1 }
 0x29f   :  { %v1592_v42 = vpack.c.bf16 %v1585_v37, %v1584_v58  ;;  %v1572_v8 = vmax.f32 %v1544_v60, %v1545_v7  ;;  %v1488_v63 = vadd.f32 %v1487_v35, %v1355_v22  ;;  %2557 = vmatpush3.bf16.msra.mxu1 %v2819_v3  ;;  %v1546_v44 = vmax.f32 %v1486_v41, 0.0 }
 0x2a0   :  { %v1491_v25 = vpop.f32.mrf.mxu1  ;;  %2558 = vmatprep.subr.bf16.mxu1 %v2841_v15  ;;  %v1383_v60 = vadd.f32 %v3615_v39, %v3613_v38  ;;  %v1385_v35 = vadd.f32 %v3621_v43, %v3619_v40  ;;  %v2824_v40 = vld [vmem:[%s3824_s7 + $0x38] sm:$0xff]   ;;  %v2825_v43 = vld [vmem:[%s3824_s7 + $0x30] sm:$0xff]  }
 0x2a1   :  { %v1547_v36 = vmax.f32 %v1488_v63, 0.0  ;;  %v1492_v46 = vadd.f32 %v1491_v25, %v1359_v23 }
 0x2a2   :  { %v1493_v13 = vpop.f32.mrf.mxu1 }
 0x2a3   :  { %v1573_v2 = vmax.f32 %v1546_v44, %v1547_v36  ;;  %v1494_v14 = vadd.f32 %v1493_v13, %v1361_v5  ;;  %2559 = vmatpush3.bf16.msra.mxu1 %v2820_v12  ;;  %v1548_v51 = vmax.f32 %v1492_v46, 0.0  ;;  %v2826_v46 = vld [vmem:[%s3824_s7 + $0x28] sm:$0xff]   ;;  %v2827_v13 = vld [vmem:[%s3824_s7 + $0x20] sm:$0xff]  }
 0x2a4   :  { %v1495_v48 = vpop.f32.mrf.mxu1  ;;  %2560 = vmatprep.subr.bf16.mxu1 %v2841_v15 }
 0x2a5   :  { %v1549_v6 = vmax.f32 %v1494_v14, 0.0  ;;  %v1496_v16 = vadd.f32 %v1495_v48, %v1363_v26  ;;  %v2828_v26 = vld [vmem:[%s3824_s7 + $0x18] sm:$0xff]   ;;  %v2830_v14 = vld [vmem:[%s3824_s7 + $0x8] sm:$0xff]  }
 0x2a6   :  { %v1497_v18 = vpop.f32.mrf.mxu1  ;;  %v2832_v48 = vld [vmem:[%s3825_s9 + $0x38] sm:$0xff]  }
 0x2a7   :  { %v1574_v56 = vmax.f32 %v1548_v51, %v1549_v6  ;;  %v1498_v57 = vadd.f32 %v1497_v18, %v1365_v27  ;;  %2561 = vmatpush3.bf16.msra.mxu1 %v2821_v50  ;;  %v1550_v24 = vmax.f32 %v1496_v16, 0.0  ;;  %v2831_v50 = vld [vmem:[%s3824_s7] sm:$0xff]   ;;  %v2833_v27 = vld [vmem:[%s3825_s9 + $0x30] sm:$0xff]   ;;  %v2834_v51 = vld [vmem:[%s3825_s9 + $0x28] sm:$0xff]  }
 0x2a8   :  { %v1501_v53 = vpop.f32.mrf.mxu1  ;;  %2562 = vmatprep.subr.bf16.mxu1 %v2841_v15  ;;  %v2835_v6 = vld [vmem:[%s3825_s9 + $0x20] sm:$0xff]   ;;  %v2836_v16 = vld [vmem:[%s3825_s9 + $0x18] sm:$0xff]  }
 0x2a9   :  { %v1586_v31 = vmax.f32 %v1572_v8, %v1574_v56  ;;  %v1551_v20 = vmax.f32 %v1498_v57, 0.0  ;;  %v1502_v49 = vadd.f32 %v1501_v53, %v1369_v28 }
 0x2aa   :  { %v1503_v61 = vpop.f32.mrf.mxu1 }
 0x2ab   :  { %v1575_v62 = vmax.f32 %v1550_v24, %v1551_v20  ;;  %v1504_v45 = vadd.f32 %v1503_v61, %v1371_v17  ;;  %2563 = vmatpush3.bf16.msra.mxu1 %v2822_v19  ;;  %v1552_v58 = vmax.f32 %v1502_v49, 0.0  ;;  %v2420_v24 = vld [vmem:[%s3826_s6] ss:$0 sm:$0xff] }
 0x2ac   :  { %v1505_v55 = vpop.f32.mrf.mxu1  ;;  %2564 = vmatprep.subr.bf16.mxu1 %v2841_v15 }
 0x2ad   :  { %v1587_v47 = vmax.f32 %v1573_v2, %v1575_v62  ;;  %v1553_v0 = vmax.f32 %v1504_v45, 0.0  ;;  %v1506_v1 = vadd.f32 %v1505_v55, %v1373_v32  ;;  %v2829_v2 = vld [vmem:[%s3824_s7 + $0x10] sm:$0xff]  }
 0x2ae   :  { %v1507_v10 = vpop.f32.mrf.mxu1 }
 0x2af   :  { %v1576_v4 = vmax.f32 %v1552_v58, %v1553_v0  ;;  %v1508_v21 = vadd.f32 %v1507_v10, %v1375_v33  ;;  %v1593_v59 = vpack.c.bf16 %v1587_v47, %v1586_v31  ;;  %2565 = vmatpush3.bf16.msra.mxu1 %v2823_v9  ;;  %v1554_v3 = vmax.f32 %v1506_v1, 0.0 }
 0x2b0   :  { %v1511_v30 = vpop.f32.mrf.mxu1  ;;  %2590 = vmatprep.subr.bf16.mxu1 %v2841_v15 }
 0x2b1   :  { %v1555_v22 = vmax.f32 %v1508_v21, 0.0  ;;  %v1512_v11 = vadd.f32 %v1511_v30, %v1379_v34  ;;  %1995 = vmatprep.mubr.bf16.mxu0 %v1593_v59  ;;  %v2837_v59 = vld [vmem:[%s3825_s9 + $0x10] sm:$0xff]   ;;  %v2838_v30 = vld [vmem:[%s3825_s9 + $0x8] sm:$0xff]  }
 0x2b2   :  { %v1513_v37 = vpop.f32.mrf.mxu1  ;;  %1996 = vmatmul.mubr.bf16.vlgmr.msra.gmra.mxu0 %v1592_v42 }
 0x2b3   :  { %v1577_v52 = vmax.f32 %v1554_v3, %v1555_v22  ;;  %v1514_v7 = vadd.f32 %v1513_v37, %v1381_v54  ;;  %2586 = vmatprep.mubr.msk.bf16.mxu0 %vm2842_vm2, %v2841_v15  ;;  %v1556_v23 = vmax.f32 %v1512_v11, 0.0  ;;  %2571 = vmatpush3.bf16.msra.mxu0 %v2824_v40  ;;  %v2839_v54 = vld [vmem:[%s3825_s9] sm:$0xff]  }
 0x2b4   :  { %v1515_v41 = vpop.f32.mrf.mxu1  ;;  %2572 = vmatprep.subr.bf16.mxu0 %v2841_v15  ;;  %v2461_v3 = vld [vmem:[%s3827_s8] ss:$0 sm:$0xff] }
 0x2b5   :  { %v1557_v29 = vmax.f32 %v1514_v7, 0.0  ;;  %v1516_v8 = vadd.f32 %v1515_v41, %v1383_v60 }
 0x2b6   :  { %v1517_v63 = vpop.f32.mrf.mxu1 }
 0x2b7   :  { %v1578_v12 = vmax.f32 %v1556_v23, %v1557_v29  ;;  %v1518_v25 = vadd.f32 %v1517_v63, %v1385_v35  ;;  %v1558_v42 = vmax.f32 %v1516_v8, 0.0  ;;  %2573 = vmatpush3.bf16.msra.mxu0 %v2825_v43 }
 0x2b8   :  { %2574 = vmatprep.subr.bf16.mxu0 %v2841_v15 }
 0x2b9   :  { %v1588_v5 = vmax.f32 %v1576_v4, %v1578_v12  ;;  %v1559_v44 = vmax.f32 %v1518_v25, 0.0 }
 0x2bb   :  { %v1579_v36 = vmax.f32 %v1558_v42, %v1559_v44  ;;  %2575 = vmatpush3.bf16.msra.mxu0 %v2826_v46 }
 0x2bc   :  { %2576 = vmatprep.subr.bf16.mxu0 %v2841_v15 }
 0x2bd   :  { %v1589_v38 = vmax.f32 %v1577_v52, %v1579_v36 }
 0x2bf   :  { %v1594_v39 = vpack.c.bf16 %v1589_v38, %v1588_v5  ;;  %2577 = vmatpush3.bf16.msra.mxu0 %v2827_v13 }
 0x2c0   :  { %2578 = vmatprep.subr.bf16.mxu0 %v2841_v15 }
 0x2c1   :  { %2567 = vmatmul.mubr.bf16.vlgmr.msra.gmra.mxu1 %v1594_v39 }
 0x2c2   :  { %2606 = vmatprep.mubr.msk.bf16.mxu1 %vm2842_vm2, %v2841_v15  ;;  %2591 = vmatpush3.bf16.msra.mxu1 %v2832_v48 }
 0x2c3   :  { %2579 = vmatpush3.bf16.msra.mxu0 %v2828_v26  ;;  %2592 = vmatprep.subr.bf16.mxu1 %v2841_v15 }
 0x2c4   :  { %2580 = vmatprep.subr.bf16.mxu0 %v2841_v15 }
 0x2c6   :  { %2593 = vmatpush3.bf16.msra.mxu1 %v2833_v27 }
 0x2c7   :  { %2581 = vmatpush3.bf16.msra.mxu0 %v2829_v2  ;;  %2594 = vmatprep.subr.bf16.mxu1 %v2841_v15 }
 0x2c8   :  { %2582 = vmatprep.subr.bf16.mxu0 %v2841_v15 }
 0x2ca   :  { %2595 = vmatpush3.bf16.msra.mxu1 %v2834_v51 }
 0x2cb   :  { %2583 = vmatpush3.bf16.msra.mxu0 %v2830_v14  ;;  %2596 = vmatprep.subr.bf16.mxu1 %v2841_v15 }
 0x2cc   :  { %2584 = vmatprep.subr.bf16.mxu0 %v2841_v15 }
 0x2ce   :  { %2597 = vmatpush3.bf16.msra.mxu1 %v2835_v6 }
 0x2cf   :  { %2585 = vmatpush3.bf16.msra.mxu0 %v2831_v50  ;;  %2598 = vmatprep.subr.bf16.mxu1 %v2841_v15 }
 0x2d2   :  { %2599 = vmatpush3.bf16.msra.mxu1 %v2836_v16 }
 0x2d3   :  { %2600 = vmatprep.subr.bf16.mxu1 %v2841_v15 }
 0x2d6   :  { %2601 = vmatpush3.bf16.msra.mxu1 %v2837_v59 }
 0x2d7   :  { %2602 = vmatprep.subr.bf16.mxu1 %v2841_v15 }
 0x2da   :  { %2603 = vmatpush3.bf16.msra.mxu1 %v2838_v30 }
 0x2db   :  { %2604 = vmatprep.subr.bf16.mxu1 %v2841_v15  ;;  %v2470_v15 = vld [vmem:[%s3828_s10] ss:$0 sm:$0xff] }
 0x2de   :  { %2605 = vmatpush3.bf16.msra.mxu1 %v2839_v54 }
 0x352   :  { %v2495_v18 = vpop.f32.mrf.mxu1 }
 0x354   :  { %v2496_v56 = vpop.f32.mrf.mxu1 }
 0x355   :  { %v2497_v31 = vadd.f32 %v2496_v56, %v2495_v18 }
 0x356   :  { %v2498_v19 = vpop.f32.mrf.mxu1 }
 0x357   :  { %v1957_v32 = vadd.f32 %v2497_v31, %v2420_v24 }
 0x358   :  { %v2499_v53 = vpop.f32.mrf.mxu1 }
 0x359   :  { %v2500_v49 = vadd.f32 %v2499_v53, %v2498_v19 }
 0x35b   :  { %v1960_v9 = vadd.f32 %v2500_v49, %v2420_v24 }
 0x372   :  { %v2517_v28 = vpop.f32.mrf.mxu0 }
 0x374   :  { %v2518_v57 = vpop.f32.mrf.mxu0 }
 0x375   :  { %v2519_v61 = vadd.f32 %v2518_v57, %v2517_v28 }
 0x376   :  { %v2520_v17 = vpop.f32.mrf.mxu0 }
 0x377   :  { %v1998_v33 = vadd.f32 %v2519_v61, %v1957_v32 }
 0x378   :  { %v2521_v20 = vpop.f32.mrf.mxu0 }
 0x379   :  { %v2522_v62 = vadd.f32 %v2521_v20, %v2520_v17 }
 0x37b   :  { %v2001_v58 = vadd.f32 %v2522_v62, %v1960_v9 }
 0x381   :  { %v2038_v45 = vpop.f32.mrf.mxu1 }
 0x382   :  { %v2039_v47 = vadd.f32 %v2038_v45, %v1998_v33 }
 0x383   :  { %v2568_v55 = vpop.f32.mrf.mxu1 }
 0x384   :  { %v2045_v34 = vmax.f32 %v2039_v47, 0.0 }
 0x385   :  { %v2041_v0 = vpop.f32.mrf.mxu1 }
 0x386   :  { %v2042_v1 = vadd.f32 %v2041_v0, %v2001_v58 }
 0x387   :  { %v2569_v10 = vpop.f32.mrf.mxu1 }
 0x388   :  { %v2046_v4 = vmax.f32 %v2042_v1, 0.0 }
 0x38a   :  { %v2047_v21 = vpack.c.bf16 %v2046_v4, %v2045_v34 }
 0x38c   :  { %2587 = vmatmul.mubr.bf16.vlgmr.msra.gmra.mxu0 %v2047_v21 }
 0x44c   :  { %v2153_v22 = vpop.f32.mrf.mxu0 }
 0x44d   :  { %v2154_v37 = vadd.f32 %v2461_v3, %v2153_v22 }
 0x44e   :  { %v2588_v11 = vpop.f32.mrf.mxu0 }
 0x44f   :  { %v2160_v41 = vmax.f32 %v2154_v37, 0.0 }
 0x450   :  { %v2156_v60 = vpop.f32.mrf.mxu0 }
 0x451   :  { %v2157_v52 = vadd.f32 %v2461_v3, %v2156_v60 }
 0x452   :  { %v2589_v7 = vpop.f32.mrf.mxu0 }
 0x453   :  { %v2161_v35 = vmax.f32 %v2157_v52, 0.0 }
 0x455   :  { %v2162_v23 = vpack.c.bf16 %v2161_v35, %v2160_v41 }
 0x457   :  { %2607 = vmatmul.mubr.bf16.vlgmr.msra.gmra.mxu1 %v2162_v23 }
 0x517   :  { %v2268_v29 = vpop.f32.mrf.mxu1 }
 0x518   :  { %v2269_v8 = vadd.f32 %v2470_v15, %v2268_v29 }
 0x519   :  { %v2608_v63 = vpop.f32.mrf.mxu1 }
 0x51a   :  { %2275 = vst [vmem:[%s3829_s11] sm:$0xff] %v2269_v8 }
 0x51b   :  { %v2271_v12 = vpop.f32.mrf.mxu1 }
 0x51c   :  { %v2272_v25 = vadd.f32 %v2470_v15, %v2271_v12 }
 0x51d   :  { %v2609_v5 = vpop.f32.mrf.mxu1 }
 0x51e   :  { %2276 = vst [vmem:[%s3829_s11 + $0x8] sm:$0xff] %v2272_v25 }

</bundles_post_ra>
